<compile_context>
chip_gen: v7x
topology: tpu7x:2x2x1
jax: 0.10.0
libtpu: 0.0.40
codegen_flags: <defaults>
</compile_context>

<pallas_src>
import functools
import math

import jax
import jax.numpy as jnp
import numpy as np
from jax.experimental import pallas as pl
from jax.experimental.pallas import tpu as pltpu

LN_EPS = 1e-5          # torch nn.LayerNorm default
_BISECT_ITERS = 30     # tau bracket shrinks to ~2^-30 (< f32 ulp of tau)


# ----------------------------------------------------------------------------
# In-kernel helpers (f32 elementwise math)
# ----------------------------------------------------------------------------
def _layer_norm(z, gamma, beta):
    mu = jnp.mean(z, axis=-1, keepdims=True)
    zc = z - mu
    var = jnp.mean(zc * zc, axis=-1, keepdims=True)
    return zc * jax.lax.rsqrt(var + LN_EPS) * gamma + beta


def _entmax15_rows(raw_scores, half_scale):
    """Exact 1.5-entmax along the last axis via bisection on the threshold.

    Solves sum_j clamp(x_j - tau, 0)^2 == 1 with x = (s - max(s)) * half_scale,
    where half_scale folds both the 1/sqrt(dh) attention scale and entmax's
    divide-by-2.  After the shift max(x) == 0, so tau* is bracketed in
    [-1, 0]; ~30 halvings reach f32 precision.  Pure VPU work + one lane-sum
    per iteration, no sort, no 3-D intermediates.
    """
    x = (raw_scores - jnp.max(raw_scores, axis=-1, keepdims=True)) * half_scale
    r = x.shape[0]
    lo = jnp.full((r, 1), -1.0, jnp.float32)
    hi = jnp.zeros((r, 1), jnp.float32)

    def body(_, carry):
        lo, hi = carry
        mid = (lo + hi) * 0.5
        p = jnp.maximum(x - mid, 0.0)
        mass = jnp.sum(p * p, axis=-1, keepdims=True)
        go_up = mass >= 1.0            # tau must grow to shrink the mass
        return jnp.where(go_up, mid, lo), jnp.where(go_up, hi, mid)

    lo, hi = jax.lax.fori_loop(0, _BISECT_ITERS, body, (lo, hi))
    p = jnp.maximum(x - (lo + hi) * 0.5, 0.0)
    p = p * p
    # exact row normalization absorbs the residual bisection error
    return p / jnp.sum(p, axis=-1, keepdims=True)


# ----------------------------------------------------------------------------
# Fused encoder kernel: one grid step handles one batch element.
# ----------------------------------------------------------------------------
def _encoder_kernel(x_ref, lng_ref, lnb_ref, wqkv_ref, bqkv_ref, wo_ref,
                    bo_ref, w1_ref, b1_ref, w2_ref, b2_ref, o_ref, *, heads):
    f32, bf16 = jnp.float32, jnp.bfloat16
    x = x_ref[...]                                   # (S, D) f32
    s, d = x.shape
    dh = d // heads
    half_scale = 0.5 / math.sqrt(dh)                 # folds 1/sqrt(dh) + /2

    lng = lng_ref[...]                               # (3, D): attn / ff / final
    lnb = lnb_ref[...]

    # ---- attention sub-layer (pre-norm) ------------------------------------
    y = _layer_norm(x, lng[0:1, :], lnb[0:1, :])
    qkv = jnp.dot(y.astype(bf16), wqkv_ref[...],
                  preferred_element_type=f32) + bqkv_ref[...]       # (S, 3D)

    head_outs = []
    for h in range(heads):                           # static unroll (small H)
        c0 = h * dh
        qh = qkv[:, c0:c0 + dh].astype(bf16)
        kh = qkv[:, d + c0:d + c0 + dh].astype(bf16)
        vh = qkv[:, 2 * d + c0:2 * d + c0 + dh].astype(bf16)
        raw = jax.lax.dot_general(qh, kh, (((1,), (1,)), ((), ())),
                                  preferred_element_type=f32)       # (S, S)
        attn = _entmax15_rows(raw, half_scale)                      # f32
        head_outs.append(jnp.dot(attn.astype(bf16), vh,
                                 preferred_element_type=f32))       # (S, dh)

    # heads are contiguous lane slices -> concat is free placement; then one
    # D-contraction matmul with Wo instead of H tiny dh-contractions.
    merged = jnp.concatenate(head_outs, axis=1)                     # (S, D)
    attn_out = jnp.dot(merged.astype(bf16), wo_ref[...],
                       preferred_element_type=f32) + bo_ref[...]
    x1 = x + attn_out

    # ---- feed-forward sub-layer (pre-norm) ----------------------------------
    y2 = _layer_norm(x1, lng[1:2, :], lnb[1:2, :])
    h1 = jnp.dot(y2.astype(bf16), w1_ref[...],
                 preferred_element_type=f32) + b1_ref[...]
    sp = jnp.maximum(h1, 0.0) + jnp.log1p(jnp.exp(-jnp.abs(h1)))    # softplus
    h1 = h1 * jnp.tanh(sp)                                          # Mish (f32)
    ff = jnp.dot(h1.astype(bf16), w2_ref[...],
                 preferred_element_type=f32) + b2_ref[...]
    x2 = x1 + ff

    # ---- final LayerNorm (Encoder.norm) -------------------------------------
    o_ref[...] = _layer_norm(x2, lng[2:3, :], lnb[2:3, :]).astype(o_ref.dtype)


# ----------------------------------------------------------------------------
# Wrapper
# ----------------------------------------------------------------------------
def encoder_forward(x, params, heads):
    b, s, d = x.shape
    assert d % heads == 0
    hidden = params["w1"].shape[1]
    bf16 = jnp.bfloat16

    ln_g = jnp.stack([params["ln_attn_g"], params["ln_ff_g"], params["ln_out_g"]])
    ln_b = jnp.stack([params["ln_attn_b"], params["ln_ff_b"], params["ln_out_b"]])
    wqkv = jnp.concatenate([params["wq"], params["wk"], params["wv"]], axis=1)
    bqkv = jnp.concatenate([params["bq"], params["bk"], params["bv"]])[None, :]

    kernel = functools.partial(_encoder_kernel, heads=heads)
    const2 = lambda i: (0, 0)

    return pl.pallas_call(
        kernel,
        out_shape=jax.ShapeDtypeStruct((b, s, d), jnp.float32),
        grid=(b,),
        in_specs=[
            pl.BlockSpec((None, s, d), lambda i: (i, 0, 0)),   # x (one batch)
            pl.BlockSpec((3, d), const2),                      # LN gammas (f32)
            pl.BlockSpec((3, d), const2),                      # LN betas  (f32)
            pl.BlockSpec((d, 3 * d), const2),                  # fused Wqkv (bf16)
            pl.BlockSpec((1, 3 * d), const2),                  # fused bqkv (f32)
            pl.BlockSpec((d, d), const2),                      # Wo (bf16)
            pl.BlockSpec((1, d), const2),                      # bo (f32)
            pl.BlockSpec((d, hidden), const2),                 # W1 (bf16)
            pl.BlockSpec((1, hidden), const2),                 # b1 (f32)
            pl.BlockSpec((hidden, d), const2),                 # W2 (bf16)
            pl.BlockSpec((1, d), const2),                      # b2 (f32)
        ],
        out_specs=pl.BlockSpec((None, s, d), lambda i: (i, 0, 0)),
        compiler_params=pltpu.CompilerParams(
            dimension_semantics=("parallel",)),
    )(x.astype(jnp.float32), ln_g, ln_b,
      wqkv.astype(bf16), bqkv,
      params["wo"].astype(bf16), params["bo"][None, :],
      params["w1"].astype(bf16), params["b1"][None, :],
      params["w2"].astype(bf16), params["b2"][None, :])


# ----------------------------------------------------------------------------
# Parameter construction (deterministic, torch-Linear-style init; weights
# stored as (in, out) so the kernel applies x @ W + b)
# ----------------------------------------------------------------------------
def build_params(key, inputs, heads, hidden):
    def linear(k, fan_in, fan_out):
        kw, kb = jax.random.split(k)
        bound = 1.0 / math.sqrt(fan_in)
        w = jax.random.uniform(kw, (fan_in, fan_out), jnp.float32, -bound, bound)
        bvec = jax.random.uniform(kb, (fan_out,), jnp.float32, -bound, bound)
        return w, bvec

    keys = jax.random.split(key, 6)
    wq, bq = linear(keys[0], inputs, inputs)
    wk, bk = linear(keys[1], inputs, inputs)
    wv, bv = linear(keys[2], inputs, inputs)
    wo, bo = linear(keys[3], inputs, inputs)
    w1, b1 = linear(keys[4], inputs, hidden)
    w2, b2 = linear(keys[5], hidden, inputs)
    ones = jnp.ones((inputs,), jnp.float32)
    zeros = jnp.zeros((inputs,), jnp.float32)
    return dict(wq=wq, bq=bq, wk=wk, bk=bk, wv=wv, bv=bv, wo=wo, bo=bo,
                w1=w1, b1=b1, w2=w2, b2=b2,
                ln_attn_g=ones, ln_attn_b=zeros,
                ln_ff_g=ones, ln_ff_b=zeros,
                ln_out_g=ones, ln_out_b=zeros)


# ----------------------------------------------------------------------------
# Pure-JAX reference mirroring the PyTorch forward (mask=None, dropout=None)
# ----------------------------------------------------------------------------
def _entmax15_ref(scores):
    x = (scores - jnp.max(scores, axis=-1, keepdims=True)) * 0.5
    xsrt = -jnp.sort(-x, axis=-1)                       # descending
    c = x.shape[-1]
    rho = jnp.arange(1, c + 1, dtype=jnp.float32)
    mean = jnp.cumsum(xsrt, axis=-1) / rho
    mean_sq = jnp.cumsum(xsrt * xsrt, axis=-1) / rho
    ss = rho * (mean_sq - mean * mean)
    delta = jnp.maximum((1.0 - ss) / rho, 0.0)
    tau = mean - jnp.sqrt(delta)
    support = jnp.sum((tau <= xsrt).astype(jnp.int32), axis=-1, keepdims=True)
    tau_star = jnp.take_along_axis(tau, support - 1, axis=-1)
    return jnp.maximum(x - tau_star, 0.0) ** 2


def reference_forward(x, p, heads):
    b, s, d = x.shape
    dh = d // heads

    def ln(z, g, bta):
        mu = jnp.mean(z, axis=-1, keepdims=True)
        var = jnp.mean((z - mu) ** 2, axis=-1, keepdims=True)
        return (z - mu) / jnp.sqrt(var + LN_EPS) * g + bta

    y = ln(x, p["ln_attn_g"], p["ln_attn_b"])
    q = y @ p["wq"] + p["bq"]
    k = y @ p["wk"] + p["bk"]
    v = y @ p["wv"] + p["bv"]

    def split(t):   # (B, S, D) -> (B, H, S, dh)
        return t.reshape(b, s, heads, dh).transpose(0, 2, 1, 3)

    qh, kh, vh = split(q), split(k), split(v)
    scores = jnp.einsum("bhqd,bhkd->bhqk", qh, kh) / math.sqrt(dh)
    attn = _entmax15_ref(scores)
    out = jnp.einsum("bhqk,bhkd->bhqd", attn, vh)
    out = out.transpose(0, 2, 1, 3).reshape(b, s, d)
    out = out @ p["wo"] + p["bo"]
    x = x + out

    y = ln(x, p["ln_ff_g"], p["ln_ff_b"])
    h = y @ p["w1"] + p["b1"]
    h = h * jnp.tanh(jax.nn.softplus(h))   # Mish
    y = h @ p["w2"] + p["b2"]
    x = x + y
    return ln(x, p["ln_out_g"], p["ln_out_b"])


# ----------------------------------------------------------------------------
if __name__ == "__main__":
    B, S, INPUTS, HEADS, HIDDEN = 2, 16, 64, 4, 128

    key = jax.random.PRNGKey(0)
    kp, kx = jax.random.split(key)
    params = build_params(kp, INPUTS, HEADS, HIDDEN)
    # Make the parameters bf16-representable (used by BOTH kernel and
    # reference) so the kernel's bf16 weight cast is lossless and the
    # comparison only measures activation-rounding + algorithmic differences.
    params = jax.tree_util.tree_map(
        lambda a: a.astype(jnp.bfloat16).astype(jnp.float32), params)
    x = jax.random.normal(kx, (B, S, INPUTS), jnp.float32)

    out = encoder_forward(x, params, HEADS)
    out = jax.block_until_ready(out)

    ref = reference_forward(x, params, HEADS)
    assert out.shape == (B, S, INPUTS), out.shape
    # Tolerance sized for single-pass bf16 MXU operands (f32 accumulation) in
    # the kernel vs. an f32 reference whose matmul precision is XLA's default.
    np.testing.assert_allclose(np.asarray(out), np.asarray(ref),
                               rtol=2e-2, atol=2e-2)
    print("KERNEL_OK")
</pallas_src>

<mosaic_0001>
module attributes {stable_mosaic.version = 11 : i64} {
  func.func @_encoder_kernel(%arg0: i32, %arg1: memref<1x16x64xf32, #tpu.memory_space<vmem>>, %arg2: memref<3x64xf32, #tpu.memory_space<vmem>>, %arg3: memref<3x64xf32, #tpu.memory_space<vmem>>, %arg4: memref<64x192xbf16, #tpu.memory_space<vmem>>, %arg5: memref<1x192xf32, #tpu.memory_space<vmem>>, %arg6: memref<64x64xbf16, #tpu.memory_space<vmem>>, %arg7: memref<1x64xf32, #tpu.memory_space<vmem>>, %arg8: memref<64x128xbf16, #tpu.memory_space<vmem>>, %arg9: memref<1x128xf32, #tpu.memory_space<vmem>>, %arg10: memref<128x64xbf16, #tpu.memory_space<vmem>>, %arg11: memref<1x64xf32, #tpu.memory_space<vmem>>, %arg12: memref<1x16x64xf32, #tpu.memory_space<vmem>>) attributes {dimension_semantics = [#tpu.dimension_semantics<parallel>], iteration_bounds = array<i64: 2>, scalar_prefetch = 0 : i64, scratch_operands = 0 : i64, tpu.core_type = #tpu.core_type<tc>, window_params = [{transform_indices = @transform_0, window_bounds = array<i64: 1, 16, 64>}, {pipeline_mode = #tpu.pipeline_mode<synchronous>, transform_indices = @transform_1, window_bounds = array<i64: 3, 64>}, {pipeline_mode = #tpu.pipeline_mode<synchronous>, transform_indices = @transform_2, window_bounds = array<i64: 3, 64>}, {pipeline_mode = #tpu.pipeline_mode<synchronous>, transform_indices = @transform_3, window_bounds = array<i64: 64, 192>}, {pipeline_mode = #tpu.pipeline_mode<synchronous>, transform_indices = @transform_4, window_bounds = array<i64: 1, 192>}, {pipeline_mode = #tpu.pipeline_mode<synchronous>, transform_indices = @transform_5, window_bounds = array<i64: 64, 64>}, {pipeline_mode = #tpu.pipeline_mode<synchronous>, transform_indices = @transform_6, window_bounds = array<i64: 1, 64>}, {pipeline_mode = #tpu.pipeline_mode<synchronous>, transform_indices = @transform_7, window_bounds = array<i64: 64, 128>}, {pipeline_mode = #tpu.pipeline_mode<synchronous>, transform_indices = @transform_8, window_bounds = array<i64: 1, 128>}, {pipeline_mode = #tpu.pipeline_mode<synchronous>, transform_indices = @transform_9, window_bounds = array<i64: 128, 64>}, {pipeline_mode = #tpu.pipeline_mode<synchronous>, transform_indices = @transform_10, window_bounds = array<i64: 1, 64>}, {transform_indices = @transform_11, window_bounds = array<i64: 1, 16, 64>}]} {
    %c0 = arith.constant 0 : index
    %c0_0 = arith.constant 0 : index
    %c0_1 = arith.constant 0 : index
    %0 = vector.load %arg1[%c0, %c0_0, %c0_1] : memref<1x16x64xf32, #tpu.memory_space<vmem>>, vector<1x16x64xf32>
    %1 = vector.shape_cast %0 : vector<1x16x64xf32> to vector<16x64xf32>
    %c0_2 = arith.constant 0 : index
    %c0_3 = arith.constant 0 : index
    %2 = vector.load %arg2[%c0_2, %c0_3] : memref<3x64xf32, #tpu.memory_space<vmem>>, vector<3x64xf32>
    %c0_4 = arith.constant 0 : index
    %c0_5 = arith.constant 0 : index
    %3 = vector.load %arg3[%c0_4, %c0_5] : memref<3x64xf32, #tpu.memory_space<vmem>>, vector<3x64xf32>
    %4 = vector.extract_strided_slice %2 {offsets = [0, 0], sizes = [1, 64], strides = [1, 1]} : vector<3x64xf32> to vector<1x64xf32>
    %5 = vector.extract_strided_slice %3 {offsets = [0, 0], sizes = [1, 64], strides = [1, 1]} : vector<3x64xf32> to vector<1x64xf32>
    %cst = arith.constant dense<0.000000e+00> : vector<16xf32>
    %6 = vector.multi_reduction <add>, %1, %cst [1] : vector<16x64xf32> to vector<16xf32>
    %7 = vector.shape_cast %6 : vector<16xf32> to vector<16x1xf32>
    %cst_6 = arith.constant 6.400000e+01 : f32
    %8 = vector.broadcast %cst_6 : f32 to vector<16x1xf32>
    %9 = arith.divf %7, %8 : vector<16x1xf32>
    %10 = vector.broadcast %9 : vector<16x1xf32> to vector<16x64xf32>
    %11 = arith.subf %1, %10 : vector<16x64xf32>
    %12 = arith.mulf %11, %11 : vector<16x64xf32>
    %cst_7 = arith.constant dense<0.000000e+00> : vector<16xf32>
    %13 = vector.multi_reduction <add>, %12, %cst_7 [1] : vector<16x64xf32> to vector<16xf32>
    %14 = vector.shape_cast %13 : vector<16xf32> to vector<16x1xf32>
    %cst_8 = arith.constant 6.400000e+01 : f32
    %15 = vector.broadcast %cst_8 : f32 to vector<16x1xf32>
    %16 = arith.divf %14, %15 : vector<16x1xf32>
    %cst_9 = arith.constant 9.99999974E-6 : f32
    %17 = vector.broadcast %cst_9 : f32 to vector<16x1xf32>
    %18 = arith.addf %16, %17 : vector<16x1xf32>
    %19 = math.rsqrt %18 : vector<16x1xf32>
    %20 = vector.broadcast %19 : vector<16x1xf32> to vector<16x64xf32>
    %21 = arith.mulf %11, %20 : vector<16x64xf32>
    %22 = vector.broadcast %4 : vector<1x64xf32> to vector<16x64xf32>
    %23 = arith.mulf %21, %22 : vector<16x64xf32>
    %24 = vector.broadcast %5 : vector<1x64xf32> to vector<16x64xf32>
    %25 = arith.addf %23, %24 : vector<16x64xf32>
    %26 = arith.truncf %25 : vector<16x64xf32> to vector<16x64xbf16>
    %c0_10 = arith.constant 0 : index
    %c0_11 = arith.constant 0 : index
    %27 = vector.load %arg4[%c0_10, %c0_11] : memref<64x192xbf16, #tpu.memory_space<vmem>>, vector<64x192xbf16>
    %cst_12 = arith.constant dense<0.000000e+00> : vector<16x192xf32>
    %28 = tpu.matmul %26, %27, %cst_12 {dimension_numbers = #tpu.dot_dimension_numbers<[1], [0], [0], [1], [0, 0, 1, 1], [], []>} : vector<16x64xbf16>, vector<64x192xbf16>, vector<16x192xf32> -> vector<16x192xf32>
    %c0_13 = arith.constant 0 : index
    %c0_14 = arith.constant 0 : index
    %29 = vector.load %arg5[%c0_13, %c0_14] : memref<1x192xf32, #tpu.memory_space<vmem>>, vector<1x192xf32>
    %30 = vector.broadcast %29 : vector<1x192xf32> to vector<16x192xf32>
    %31 = arith.addf %28, %30 : vector<16x192xf32>
    %32 = vector.extract_strided_slice %31 {offsets = [0, 0], sizes = [16, 16], strides = [1, 1]} : vector<16x192xf32> to vector<16x16xf32>
    %33 = arith.truncf %32 : vector<16x16xf32> to vector<16x16xbf16>
    %34 = vector.extract_strided_slice %31 {offsets = [0, 64], sizes = [16, 16], strides = [1, 1]} : vector<16x192xf32> to vector<16x16xf32>
    %35 = arith.truncf %34 : vector<16x16xf32> to vector<16x16xbf16>
    %36 = vector.extract_strided_slice %31 {offsets = [0, 128], sizes = [16, 16], strides = [1, 1]} : vector<16x192xf32> to vector<16x16xf32>
    %37 = arith.truncf %36 : vector<16x16xf32> to vector<16x16xbf16>
    %cst_15 = arith.constant dense<0.000000e+00> : vector<16x16xf32>
    %38 = tpu.matmul %33, %35, %cst_15 {dimension_numbers = #tpu.dot_dimension_numbers<[1], [1], [0], [0], [0, 0, 1, 0], [], []>} : vector<16x16xbf16>, vector<16x16xbf16>, vector<16x16xf32> -> vector<16x16xf32>
    %cst_16 = arith.constant dense<0xFF800000> : vector<16xf32>
    %39 = vector.multi_reduction <maximumf>, %38, %cst_16 [1] : vector<16x16xf32> to vector<16xf32>
    %40 = vector.shape_cast %39 : vector<16xf32> to vector<16x1xf32>
    %41 = vector.broadcast %40 : vector<16x1xf32> to vector<16x16xf32>
    %42 = arith.subf %38, %41 : vector<16x16xf32>
    %cst_17 = arith.constant 1.250000e-01 : f32
    %43 = vector.broadcast %cst_17 : f32 to vector<16x16xf32>
    %44 = arith.mulf %42, %43 : vector<16x16xf32>
    %cst_18 = arith.constant -1.000000e+00 : f32
    %45 = vector.broadcast %cst_18 : f32 to vector<16x1xf32>
    %cst_19 = arith.constant 0.000000e+00 : f32
    %46 = vector.broadcast %cst_19 : f32 to vector<16x1xf32>
    %c0_i32 = arith.constant 0 : i32
    %c30_i32 = arith.constant 30 : i32
    %47 = arith.addi %c0_i32, %c30_i32 : i32
    %c1_i32 = arith.constant 1 : i32
    %48:2 = scf.for %arg13 = %c0_i32 to %47 step %c1_i32 iter_args(%arg14 = %45, %arg15 = %46) -> (vector<16x1xf32>, vector<16x1xf32>)  : i32 {
      %234 = arith.addf %arg14, %arg15 : vector<16x1xf32>
      %cst_90 = arith.constant 5.000000e-01 : f32
      %235 = vector.broadcast %cst_90 : f32 to vector<16x1xf32>
      %236 = arith.mulf %234, %235 : vector<16x1xf32>
      %237 = vector.broadcast %236 : vector<16x1xf32> to vector<16x16xf32>
      %238 = arith.subf %44, %237 : vector<16x16xf32>
      %cst_91 = arith.constant 0.000000e+00 : f32
      %239 = vector.broadcast %cst_91 : f32 to vector<16x16xf32>
      %240 = arith.maximumf %238, %239 : vector<16x16xf32>
      %241 = arith.mulf %240, %240 : vector<16x16xf32>
      %cst_92 = arith.constant dense<0.000000e+00> : vector<16xf32>
      %242 = vector.multi_reduction <add>, %241, %cst_92 [1] : vector<16x16xf32> to vector<16xf32>
      %243 = vector.shape_cast %242 : vector<16xf32> to vector<16x1xf32>
      %cst_93 = arith.constant 1.000000e+00 : f32
      %244 = vector.broadcast %cst_93 : f32 to vector<16x1xf32>
      %245 = arith.cmpf oge, %243, %244 : vector<16x1xf32>
      %246 = arith.select %245, %236, %arg14 : vector<16x1xi1>, vector<16x1xf32>
      %247 = arith.select %245, %arg15, %236 : vector<16x1xi1>, vector<16x1xf32>
      scf.yield %246, %247 : vector<16x1xf32>, vector<16x1xf32>
    }
    %49 = arith.addf %48#0, %48#1 : vector<16x1xf32>
    %cst_20 = arith.constant 5.000000e-01 : f32
    %50 = vector.broadcast %cst_20 : f32 to vector<16x1xf32>
    %51 = arith.mulf %49, %50 : vector<16x1xf32>
    %52 = vector.broadcast %51 : vector<16x1xf32> to vector<16x16xf32>
    %53 = arith.subf %44, %52 : vector<16x16xf32>
    %cst_21 = arith.constant 0.000000e+00 : f32
    %54 = vector.broadcast %cst_21 : f32 to vector<16x16xf32>
    %55 = arith.maximumf %53, %54 : vector<16x16xf32>
    %56 = arith.mulf %55, %55 : vector<16x16xf32>
    %cst_22 = arith.constant dense<0.000000e+00> : vector<16xf32>
    %57 = vector.multi_reduction <add>, %56, %cst_22 [1] : vector<16x16xf32> to vector<16xf32>
    %58 = vector.shape_cast %57 : vector<16xf32> to vector<16x1xf32>
    %59 = vector.broadcast %58 : vector<16x1xf32> to vector<16x16xf32>
    %60 = arith.divf %56, %59 : vector<16x16xf32>
    %61 = arith.truncf %60 : vector<16x16xf32> to vector<16x16xbf16>
    %cst_23 = arith.constant dense<0.000000e+00> : vector<16x16xf32>
    %62 = tpu.matmul %61, %37, %cst_23 {dimension_numbers = #tpu.dot_dimension_numbers<[1], [0], [0], [1], [0, 0, 1, 1], [], []>} : vector<16x16xbf16>, vector<16x16xbf16>, vector<16x16xf32> -> vector<16x16xf32>
    %63 = vector.extract_strided_slice %31 {offsets = [0, 16], sizes = [16, 16], strides = [1, 1]} : vector<16x192xf32> to vector<16x16xf32>
    %64 = arith.truncf %63 : vector<16x16xf32> to vector<16x16xbf16>
    %65 = vector.extract_strided_slice %31 {offsets = [0, 80], sizes = [16, 16], strides = [1, 1]} : vector<16x192xf32> to vector<16x16xf32>
    %66 = arith.truncf %65 : vector<16x16xf32> to vector<16x16xbf16>
    %67 = vector.extract_strided_slice %31 {offsets = [0, 144], sizes = [16, 16], strides = [1, 1]} : vector<16x192xf32> to vector<16x16xf32>
    %68 = arith.truncf %67 : vector<16x16xf32> to vector<16x16xbf16>
    %cst_24 = arith.constant dense<0.000000e+00> : vector<16x16xf32>
    %69 = tpu.matmul %64, %66, %cst_24 {dimension_numbers = #tpu.dot_dimension_numbers<[1], [1], [0], [0], [0, 0, 1, 0], [], []>} : vector<16x16xbf16>, vector<16x16xbf16>, vector<16x16xf32> -> vector<16x16xf32>
    %cst_25 = arith.constant dense<0xFF800000> : vector<16xf32>
    %70 = vector.multi_reduction <maximumf>, %69, %cst_25 [1] : vector<16x16xf32> to vector<16xf32>
    %71 = vector.shape_cast %70 : vector<16xf32> to vector<16x1xf32>
    %72 = vector.broadcast %71 : vector<16x1xf32> to vector<16x16xf32>
    %73 = arith.subf %69, %72 : vector<16x16xf32>
    %cst_26 = arith.constant 1.250000e-01 : f32
    %74 = vector.broadcast %cst_26 : f32 to vector<16x16xf32>
    %75 = arith.mulf %73, %74 : vector<16x16xf32>
    %cst_27 = arith.constant -1.000000e+00 : f32
    %76 = vector.broadcast %cst_27 : f32 to vector<16x1xf32>
    %cst_28 = arith.constant 0.000000e+00 : f32
    %77 = vector.broadcast %cst_28 : f32 to vector<16x1xf32>
    %c0_i32_29 = arith.constant 0 : i32
    %c30_i32_30 = arith.constant 30 : i32
    %78 = arith.addi %c0_i32_29, %c30_i32_30 : i32
    %c1_i32_31 = arith.constant 1 : i32
    %79:2 = scf.for %arg13 = %c0_i32_29 to %78 step %c1_i32_31 iter_args(%arg14 = %76, %arg15 = %77) -> (vector<16x1xf32>, vector<16x1xf32>)  : i32 {
      %234 = arith.addf %arg14, %arg15 : vector<16x1xf32>
      %cst_90 = arith.constant 5.000000e-01 : f32
      %235 = vector.broadcast %cst_90 : f32 to vector<16x1xf32>
      %236 = arith.mulf %234, %235 : vector<16x1xf32>
      %237 = vector.broadcast %236 : vector<16x1xf32> to vector<16x16xf32>
      %238 = arith.subf %75, %237 : vector<16x16xf32>
      %cst_91 = arith.constant 0.000000e+00 : f32
      %239 = vector.broadcast %cst_91 : f32 to vector<16x16xf32>
      %240 = arith.maximumf %238, %239 : vector<16x16xf32>
      %241 = arith.mulf %240, %240 : vector<16x16xf32>
      %cst_92 = arith.constant dense<0.000000e+00> : vector<16xf32>
      %242 = vector.multi_reduction <add>, %241, %cst_92 [1] : vector<16x16xf32> to vector<16xf32>
      %243 = vector.shape_cast %242 : vector<16xf32> to vector<16x1xf32>
      %cst_93 = arith.constant 1.000000e+00 : f32
      %244 = vector.broadcast %cst_93 : f32 to vector<16x1xf32>
      %245 = arith.cmpf oge, %243, %244 : vector<16x1xf32>
      %246 = arith.select %245, %236, %arg14 : vector<16x1xi1>, vector<16x1xf32>
      %247 = arith.select %245, %arg15, %236 : vector<16x1xi1>, vector<16x1xf32>
      scf.yield %246, %247 : vector<16x1xf32>, vector<16x1xf32>
    }
    %80 = arith.addf %79#0, %79#1 : vector<16x1xf32>
    %cst_32 = arith.constant 5.000000e-01 : f32
    %81 = vector.broadcast %cst_32 : f32 to vector<16x1xf32>
    %82 = arith.mulf %80, %81 : vector<16x1xf32>
    %83 = vector.broadcast %82 : vector<16x1xf32> to vector<16x16xf32>
    %84 = arith.subf %75, %83 : vector<16x16xf32>
    %cst_33 = arith.constant 0.000000e+00 : f32
    %85 = vector.broadcast %cst_33 : f32 to vector<16x16xf32>
    %86 = arith.maximumf %84, %85 : vector<16x16xf32>
    %87 = arith.mulf %86, %86 : vector<16x16xf32>
    %cst_34 = arith.constant dense<0.000000e+00> : vector<16xf32>
    %88 = vector.multi_reduction <add>, %87, %cst_34 [1] : vector<16x16xf32> to vector<16xf32>
    %89 = vector.shape_cast %88 : vector<16xf32> to vector<16x1xf32>
    %90 = vector.broadcast %89 : vector<16x1xf32> to vector<16x16xf32>
    %91 = arith.divf %87, %90 : vector<16x16xf32>
    %92 = arith.truncf %91 : vector<16x16xf32> to vector<16x16xbf16>
    %cst_35 = arith.constant dense<0.000000e+00> : vector<16x16xf32>
    %93 = tpu.matmul %92, %68, %cst_35 {dimension_numbers = #tpu.dot_dimension_numbers<[1], [0], [0], [1], [0, 0, 1, 1], [], []>} : vector<16x16xbf16>, vector<16x16xbf16>, vector<16x16xf32> -> vector<16x16xf32>
    %94 = vector.extract_strided_slice %31 {offsets = [0, 32], sizes = [16, 16], strides = [1, 1]} : vector<16x192xf32> to vector<16x16xf32>
    %95 = arith.truncf %94 : vector<16x16xf32> to vector<16x16xbf16>
    %96 = vector.extract_strided_slice %31 {offsets = [0, 96], sizes = [16, 16], strides = [1, 1]} : vector<16x192xf32> to vector<16x16xf32>
    %97 = arith.truncf %96 : vector<16x16xf32> to vector<16x16xbf16>
    %98 = vector.extract_strided_slice %31 {offsets = [0, 160], sizes = [16, 16], strides = [1, 1]} : vector<16x192xf32> to vector<16x16xf32>
    %99 = arith.truncf %98 : vector<16x16xf32> to vector<16x16xbf16>
    %cst_36 = arith.constant dense<0.000000e+00> : vector<16x16xf32>
    %100 = tpu.matmul %95, %97, %cst_36 {dimension_numbers = #tpu.dot_dimension_numbers<[1], [1], [0], [0], [0, 0, 1, 0], [], []>} : vector<16x16xbf16>, vector<16x16xbf16>, vector<16x16xf32> -> vector<16x16xf32>
    %cst_37 = arith.constant dense<0xFF800000> : vector<16xf32>
    %101 = vector.multi_reduction <maximumf>, %100, %cst_37 [1] : vector<16x16xf32> to vector<16xf32>
    %102 = vector.shape_cast %101 : vector<16xf32> to vector<16x1xf32>
    %103 = vector.broadcast %102 : vector<16x1xf32> to vector<16x16xf32>
    %104 = arith.subf %100, %103 : vector<16x16xf32>
    %cst_38 = arith.constant 1.250000e-01 : f32
    %105 = vector.broadcast %cst_38 : f32 to vector<16x16xf32>
    %106 = arith.mulf %104, %105 : vector<16x16xf32>
    %cst_39 = arith.constant -1.000000e+00 : f32
    %107 = vector.broadcast %cst_39 : f32 to vector<16x1xf32>
    %cst_40 = arith.constant 0.000000e+00 : f32
    %108 = vector.broadcast %cst_40 : f32 to vector<16x1xf32>
    %c0_i32_41 = arith.constant 0 : i32
    %c30_i32_42 = arith.constant 30 : i32
    %109 = arith.addi %c0_i32_41, %c30_i32_42 : i32
    %c1_i32_43 = arith.constant 1 : i32
    %110:2 = scf.for %arg13 = %c0_i32_41 to %109 step %c1_i32_43 iter_args(%arg14 = %107, %arg15 = %108) -> (vector<16x1xf32>, vector<16x1xf32>)  : i32 {
      %234 = arith.addf %arg14, %arg15 : vector<16x1xf32>
      %cst_90 = arith.constant 5.000000e-01 : f32
      %235 = vector.broadcast %cst_90 : f32 to vector<16x1xf32>
      %236 = arith.mulf %234, %235 : vector<16x1xf32>
      %237 = vector.broadcast %236 : vector<16x1xf32> to vector<16x16xf32>
      %238 = arith.subf %106, %237 : vector<16x16xf32>
      %cst_91 = arith.constant 0.000000e+00 : f32
      %239 = vector.broadcast %cst_91 : f32 to vector<16x16xf32>
      %240 = arith.maximumf %238, %239 : vector<16x16xf32>
      %241 = arith.mulf %240, %240 : vector<16x16xf32>
      %cst_92 = arith.constant dense<0.000000e+00> : vector<16xf32>
      %242 = vector.multi_reduction <add>, %241, %cst_92 [1] : vector<16x16xf32> to vector<16xf32>
      %243 = vector.shape_cast %242 : vector<16xf32> to vector<16x1xf32>
      %cst_93 = arith.constant 1.000000e+00 : f32
      %244 = vector.broadcast %cst_93 : f32 to vector<16x1xf32>
      %245 = arith.cmpf oge, %243, %244 : vector<16x1xf32>
      %246 = arith.select %245, %236, %arg14 : vector<16x1xi1>, vector<16x1xf32>
      %247 = arith.select %245, %arg15, %236 : vector<16x1xi1>, vector<16x1xf32>
      scf.yield %246, %247 : vector<16x1xf32>, vector<16x1xf32>
    }
    %111 = arith.addf %110#0, %110#1 : vector<16x1xf32>
    %cst_44 = arith.constant 5.000000e-01 : f32
    %112 = vector.broadcast %cst_44 : f32 to vector<16x1xf32>
    %113 = arith.mulf %111, %112 : vector<16x1xf32>
    %114 = vector.broadcast %113 : vector<16x1xf32> to vector<16x16xf32>
    %115 = arith.subf %106, %114 : vector<16x16xf32>
    %cst_45 = arith.constant 0.000000e+00 : f32
    %116 = vector.broadcast %cst_45 : f32 to vector<16x16xf32>
    %117 = arith.maximumf %115, %116 : vector<16x16xf32>
    %118 = arith.mulf %117, %117 : vector<16x16xf32>
    %cst_46 = arith.constant dense<0.000000e+00> : vector<16xf32>
    %119 = vector.multi_reduction <add>, %118, %cst_46 [1] : vector<16x16xf32> to vector<16xf32>
    %120 = vector.shape_cast %119 : vector<16xf32> to vector<16x1xf32>
    %121 = vector.broadcast %120 : vector<16x1xf32> to vector<16x16xf32>
    %122 = arith.divf %118, %121 : vector<16x16xf32>
    %123 = arith.truncf %122 : vector<16x16xf32> to vector<16x16xbf16>
    %cst_47 = arith.constant dense<0.000000e+00> : vector<16x16xf32>
    %124 = tpu.matmul %123, %99, %cst_47 {dimension_numbers = #tpu.dot_dimension_numbers<[1], [0], [0], [1], [0, 0, 1, 1], [], []>} : vector<16x16xbf16>, vector<16x16xbf16>, vector<16x16xf32> -> vector<16x16xf32>
    %125 = vector.extract_strided_slice %31 {offsets = [0, 48], sizes = [16, 16], strides = [1, 1]} : vector<16x192xf32> to vector<16x16xf32>
    %126 = arith.truncf %125 : vector<16x16xf32> to vector<16x16xbf16>
    %127 = vector.extract_strided_slice %31 {offsets = [0, 112], sizes = [16, 16], strides = [1, 1]} : vector<16x192xf32> to vector<16x16xf32>
    %128 = arith.truncf %127 : vector<16x16xf32> to vector<16x16xbf16>
    %129 = vector.extract_strided_slice %31 {offsets = [0, 176], sizes = [16, 16], strides = [1, 1]} : vector<16x192xf32> to vector<16x16xf32>
    %130 = arith.truncf %129 : vector<16x16xf32> to vector<16x16xbf16>
    %cst_48 = arith.constant dense<0.000000e+00> : vector<16x16xf32>
    %131 = tpu.matmul %126, %128, %cst_48 {dimension_numbers = #tpu.dot_dimension_numbers<[1], [1], [0], [0], [0, 0, 1, 0], [], []>} : vector<16x16xbf16>, vector<16x16xbf16>, vector<16x16xf32> -> vector<16x16xf32>
    %cst_49 = arith.constant dense<0xFF800000> : vector<16xf32>
    %132 = vector.multi_reduction <maximumf>, %131, %cst_49 [1] : vector<16x16xf32> to vector<16xf32>
    %133 = vector.shape_cast %132 : vector<16xf32> to vector<16x1xf32>
    %134 = vector.broadcast %133 : vector<16x1xf32> to vector<16x16xf32>
    %135 = arith.subf %131, %134 : vector<16x16xf32>
    %cst_50 = arith.constant 1.250000e-01 : f32
    %136 = vector.broadcast %cst_50 : f32 to vector<16x16xf32>
    %137 = arith.mulf %135, %136 : vector<16x16xf32>
    %cst_51 = arith.constant -1.000000e+00 : f32
    %138 = vector.broadcast %cst_51 : f32 to vector<16x1xf32>
    %cst_52 = arith.constant 0.000000e+00 : f32
    %139 = vector.broadcast %cst_52 : f32 to vector<16x1xf32>
    %c0_i32_53 = arith.constant 0 : i32
    %c30_i32_54 = arith.constant 30 : i32
    %140 = arith.addi %c0_i32_53, %c30_i32_54 : i32
    %c1_i32_55 = arith.constant 1 : i32
    %141:2 = scf.for %arg13 = %c0_i32_53 to %140 step %c1_i32_55 iter_args(%arg14 = %138, %arg15 = %139) -> (vector<16x1xf32>, vector<16x1xf32>)  : i32 {
      %234 = arith.addf %arg14, %arg15 : vector<16x1xf32>
      %cst_90 = arith.constant 5.000000e-01 : f32
      %235 = vector.broadcast %cst_90 : f32 to vector<16x1xf32>
      %236 = arith.mulf %234, %235 : vector<16x1xf32>
      %237 = vector.broadcast %236 : vector<16x1xf32> to vector<16x16xf32>
      %238 = arith.subf %137, %237 : vector<16x16xf32>
      %cst_91 = arith.constant 0.000000e+00 : f32
      %239 = vector.broadcast %cst_91 : f32 to vector<16x16xf32>
      %240 = arith.maximumf %238, %239 : vector<16x16xf32>
      %241 = arith.mulf %240, %240 : vector<16x16xf32>
      %cst_92 = arith.constant dense<0.000000e+00> : vector<16xf32>
      %242 = vector.multi_reduction <add>, %241, %cst_92 [1] : vector<16x16xf32> to vector<16xf32>
      %243 = vector.shape_cast %242 : vector<16xf32> to vector<16x1xf32>
      %cst_93 = arith.constant 1.000000e+00 : f32
      %244 = vector.broadcast %cst_93 : f32 to vector<16x1xf32>
      %245 = arith.cmpf oge, %243, %244 : vector<16x1xf32>
      %246 = arith.select %245, %236, %arg14 : vector<16x1xi1>, vector<16x1xf32>
      %247 = arith.select %245, %arg15, %236 : vector<16x1xi1>, vector<16x1xf32>
      scf.yield %246, %247 : vector<16x1xf32>, vector<16x1xf32>
    }
    %142 = arith.addf %141#0, %141#1 : vector<16x1xf32>
    %cst_56 = arith.constant 5.000000e-01 : f32
    %143 = vector.broadcast %cst_56 : f32 to vector<16x1xf32>
    %144 = arith.mulf %142, %143 : vector<16x1xf32>
    %145 = vector.broadcast %144 : vector<16x1xf32> to vector<16x16xf32>
    %146 = arith.subf %137, %145 : vector<16x16xf32>
    %cst_57 = arith.constant 0.000000e+00 : f32
    %147 = vector.broadcast %cst_57 : f32 to vector<16x16xf32>
    %148 = arith.maximumf %146, %147 : vector<16x16xf32>
    %149 = arith.mulf %148, %148 : vector<16x16xf32>
    %cst_58 = arith.constant dense<0.000000e+00> : vector<16xf32>
    %150 = vector.multi_reduction <add>, %149, %cst_58 [1] : vector<16x16xf32> to vector<16xf32>
    %151 = vector.shape_cast %150 : vector<16xf32> to vector<16x1xf32>
    %152 = vector.broadcast %151 : vector<16x1xf32> to vector<16x16xf32>
    %153 = arith.divf %149, %152 : vector<16x16xf32>
    %154 = arith.truncf %153 : vector<16x16xf32> to vector<16x16xbf16>
    %cst_59 = arith.constant dense<0.000000e+00> : vector<16x16xf32>
    %155 = tpu.matmul %154, %130, %cst_59 {dimension_numbers = #tpu.dot_dimension_numbers<[1], [0], [0], [1], [0, 0, 1, 1], [], []>} : vector<16x16xbf16>, vector<16x16xbf16>, vector<16x16xf32> -> vector<16x16xf32>
    %156 = tpu.concatenate %62, %93, %124, %155 in 1 : vector<16x16xf32>, vector<16x16xf32>, vector<16x16xf32>, vector<16x16xf32> -> vector<16x64xf32>
    %157 = arith.truncf %156 : vector<16x64xf32> to vector<16x64xbf16>
    %c0_60 = arith.constant 0 : index
    %c0_61 = arith.constant 0 : index
    %158 = vector.load %arg6[%c0_60, %c0_61] : memref<64x64xbf16, #tpu.memory_space<vmem>>, vector<64x64xbf16>
    %cst_62 = arith.constant dense<0.000000e+00> : vector<16x64xf32>
    %159 = tpu.matmul %157, %158, %cst_62 {dimension_numbers = #tpu.dot_dimension_numbers<[1], [0], [0], [1], [0, 0, 1, 1], [], []>} : vector<16x64xbf16>, vector<64x64xbf16>, vector<16x64xf32> -> vector<16x64xf32>
    %c0_63 = arith.constant 0 : index
    %c0_64 = arith.constant 0 : index
    %160 = vector.load %arg7[%c0_63, %c0_64] : memref<1x64xf32, #tpu.memory_space<vmem>>, vector<1x64xf32>
    %161 = vector.broadcast %160 : vector<1x64xf32> to vector<16x64xf32>
    %162 = arith.addf %159, %161 : vector<16x64xf32>
    %163 = arith.addf %1, %162 : vector<16x64xf32>
    %164 = vector.extract_strided_slice %2 {offsets = [1, 0], sizes = [1, 64], strides = [1, 1]} : vector<3x64xf32> to vector<1x64xf32>
    %165 = vector.extract_strided_slice %3 {offsets = [1, 0], sizes = [1, 64], strides = [1, 1]} : vector<3x64xf32> to vector<1x64xf32>
    %cst_65 = arith.constant dense<0.000000e+00> : vector<16xf32>
    %166 = vector.multi_reduction <add>, %163, %cst_65 [1] : vector<16x64xf32> to vector<16xf32>
    %167 = vector.shape_cast %166 : vector<16xf32> to vector<16x1xf32>
    %cst_66 = arith.constant 6.400000e+01 : f32
    %168 = vector.broadcast %cst_66 : f32 to vector<16x1xf32>
    %169 = arith.divf %167, %168 : vector<16x1xf32>
    %170 = vector.broadcast %169 : vector<16x1xf32> to vector<16x64xf32>
    %171 = arith.subf %163, %170 : vector<16x64xf32>
    %172 = arith.mulf %171, %171 : vector<16x64xf32>
    %cst_67 = arith.constant dense<0.000000e+00> : vector<16xf32>
    %173 = vector.multi_reduction <add>, %172, %cst_67 [1] : vector<16x64xf32> to vector<16xf32>
    %174 = vector.shape_cast %173 : vector<16xf32> to vector<16x1xf32>
    %cst_68 = arith.constant 6.400000e+01 : f32
    %175 = vector.broadcast %cst_68 : f32 to vector<16x1xf32>
    %176 = arith.divf %174, %175 : vector<16x1xf32>
    %cst_69 = arith.constant 9.99999974E-6 : f32
    %177 = vector.broadcast %cst_69 : f32 to vector<16x1xf32>
    %178 = arith.addf %176, %177 : vector<16x1xf32>
    %179 = math.rsqrt %178 : vector<16x1xf32>
    %180 = vector.broadcast %179 : vector<16x1xf32> to vector<16x64xf32>
    %181 = arith.mulf %171, %180 : vector<16x64xf32>
    %182 = vector.broadcast %164 : vector<1x64xf32> to vector<16x64xf32>
    %183 = arith.mulf %181, %182 : vector<16x64xf32>
    %184 = vector.broadcast %165 : vector<1x64xf32> to vector<16x64xf32>
    %185 = arith.addf %183, %184 : vector<16x64xf32>
    %186 = arith.truncf %185 : vector<16x64xf32> to vector<16x64xbf16>
    %c0_70 = arith.constant 0 : index
    %c0_71 = arith.constant 0 : index
    %187 = vector.load %arg8[%c0_70, %c0_71] : memref<64x128xbf16, #tpu.memory_space<vmem>>, vector<64x128xbf16>
    %cst_72 = arith.constant dense<0.000000e+00> : vector<16x128xf32>
    %188 = tpu.matmul %186, %187, %cst_72 {dimension_numbers = #tpu.dot_dimension_numbers<[1], [0], [0], [1], [0, 0, 1, 1], [], []>} : vector<16x64xbf16>, vector<64x128xbf16>, vector<16x128xf32> -> vector<16x128xf32>
    %c0_73 = arith.constant 0 : index
    %c0_74 = arith.constant 0 : index
    %189 = vector.load %arg9[%c0_73, %c0_74] : memref<1x128xf32, #tpu.memory_space<vmem>>, vector<1x128xf32>
    %190 = vector.broadcast %189 : vector<1x128xf32> to vector<16x128xf32>
    %191 = arith.addf %188, %190 : vector<16x128xf32>
    %cst_75 = arith.constant 0.000000e+00 : f32
    %192 = vector.broadcast %cst_75 : f32 to vector<16x128xf32>
    %193 = arith.maximumf %191, %192 : vector<16x128xf32>
    %194 = math.absf %191 : vector<16x128xf32>
    %cst_76 = arith.constant 0.000000e+00 : f32
    %195 = vector.broadcast %cst_76 : f32 to vector<16x128xf32>
    %196 = arith.subf %195, %194 : vector<16x128xf32>
    %197 = math.exp %196 : vector<16x128xf32>
    %198 = math.log1p %197 : vector<16x128xf32>
    %199 = arith.addf %193, %198 : vector<16x128xf32>
    %200 = math.tanh %199 : vector<16x128xf32>
    %201 = arith.mulf %191, %200 : vector<16x128xf32>
    %202 = arith.truncf %201 : vector<16x128xf32> to vector<16x128xbf16>
    %c0_77 = arith.constant 0 : index
    %c0_78 = arith.constant 0 : index
    %203 = vector.load %arg10[%c0_77, %c0_78] : memref<128x64xbf16, #tpu.memory_space<vmem>>, vector<128x64xbf16>
    %cst_79 = arith.constant dense<0.000000e+00> : vector<16x64xf32>
    %204 = tpu.matmul %202, %203, %cst_79 {dimension_numbers = #tpu.dot_dimension_numbers<[1], [0], [0], [1], [0, 0, 1, 1], [], []>} : vector<16x128xbf16>, vector<128x64xbf16>, vector<16x64xf32> -> vector<16x64xf32>
    %c0_80 = arith.constant 0 : index
    %c0_81 = arith.constant 0 : index
    %205 = vector.load %arg11[%c0_80, %c0_81] : memref<1x64xf32, #tpu.memory_space<vmem>>, vector<1x64xf32>
    %206 = vector.broadcast %205 : vector<1x64xf32> to vector<16x64xf32>
    %207 = arith.addf %204, %206 : vector<16x64xf32>
    %208 = arith.addf %163, %207 : vector<16x64xf32>
    %209 = vector.extract_strided_slice %2 {offsets = [2, 0], sizes = [1, 64], strides = [1, 1]} : vector<3x64xf32> to vector<1x64xf32>
    %210 = vector.extract_strided_slice %3 {offsets = [2, 0], sizes = [1, 64], strides = [1, 1]} : vector<3x64xf32> to vector<1x64xf32>
    %cst_82 = arith.constant dense<0.000000e+00> : vector<16xf32>
    %211 = vector.multi_reduction <add>, %208, %cst_82 [1] : vector<16x64xf32> to vector<16xf32>
    %212 = vector.shape_cast %211 : vector<16xf32> to vector<16x1xf32>
    %cst_83 = arith.constant 6.400000e+01 : f32
    %213 = vector.broadcast %cst_83 : f32 to vector<16x1xf32>
    %214 = arith.divf %212, %213 : vector<16x1xf32>
    %215 = vector.broadcast %214 : vector<16x1xf32> to vector<16x64xf32>
    %216 = arith.subf %208, %215 : vector<16x64xf32>
    %217 = arith.mulf %216, %216 : vector<16x64xf32>
    %cst_84 = arith.constant dense<0.000000e+00> : vector<16xf32>
    %218 = vector.multi_reduction <add>, %217, %cst_84 [1] : vector<16x64xf32> to vector<16xf32>
    %219 = vector.shape_cast %218 : vector<16xf32> to vector<16x1xf32>
    %cst_85 = arith.constant 6.400000e+01 : f32
    %220 = vector.broadcast %cst_85 : f32 to vector<16x1xf32>
    %221 = arith.divf %219, %220 : vector<16x1xf32>
    %cst_86 = arith.constant 9.99999974E-6 : f32
    %222 = vector.broadcast %cst_86 : f32 to vector<16x1xf32>
    %223 = arith.addf %221, %222 : vector<16x1xf32>
    %224 = math.rsqrt %223 : vector<16x1xf32>
    %225 = vector.broadcast %224 : vector<16x1xf32> to vector<16x64xf32>
    %226 = arith.mulf %216, %225 : vector<16x64xf32>
    %227 = vector.broadcast %209 : vector<1x64xf32> to vector<16x64xf32>
    %228 = arith.mulf %226, %227 : vector<16x64xf32>
    %229 = vector.broadcast %210 : vector<1x64xf32> to vector<16x64xf32>
    %230 = arith.addf %228, %229 : vector<16x64xf32>
    %c0_87 = arith.constant 0 : index
    %c0_88 = arith.constant 0 : index
    %c0_89 = arith.constant 0 : index
    %231 = vector.load %arg12[%c0_87, %c0_88, %c0_89] : memref<1x16x64xf32, #tpu.memory_space<vmem>>, vector<1x16x64xf32>
    %232 = vector.shape_cast %231 : vector<1x16x64xf32> to vector<16x64xf32>
    %233 = vector.shape_cast %230 : vector<16x64xf32> to vector<1x16x64xf32>
    tpu.vector_store %arg12[%c0_87, %c0_88, %c0_89], %233 {strides = array<i32>} : memref<1x16x64xf32, #tpu.memory_space<vmem>>, vector<1x16x64xf32>,
    return
  }
  func.func @transform_0(%arg0: i32) -> (i32, i32, i32) {
    %c0_i32 = arith.constant 0 : i32
    %c0_i32_0 = arith.constant 0 : i32
    %c0_i32_1 = arith.constant 0 : i32
    return %arg0, %c0_i32, %c0_i32_0 : i32, i32, i32
  }
  func.func @transform_1(%arg0: i32) -> (i32, i32) {
    %c0_i32 = arith.constant 0 : i32
    %c0_i32_0 = arith.constant 0 : i32
    %c0_i32_1 = arith.constant 0 : i32
    return %c0_i32, %c0_i32_0 : i32, i32
  }
  func.func @transform_2(%arg0: i32) -> (i32, i32) {
    %c0_i32 = arith.constant 0 : i32
    %c0_i32_0 = arith.constant 0 : i32
    %c0_i32_1 = arith.constant 0 : i32
    return %c0_i32, %c0_i32_0 : i32, i32
  }
  func.func @transform_3(%arg0: i32) -> (i32, i32) {
    %c0_i32 = arith.constant 0 : i32
    %c0_i32_0 = arith.constant 0 : i32
    %c0_i32_1 = arith.constant 0 : i32
    return %c0_i32, %c0_i32_0 : i32, i32
  }
  func.func @transform_4(%arg0: i32) -> (i32, i32) {
    %c0_i32 = arith.constant 0 : i32
    %c0_i32_0 = arith.constant 0 : i32
    %c0_i32_1 = arith.constant 0 : i32
    return %c0_i32, %c0_i32_0 : i32, i32
  }
  func.func @transform_5(%arg0: i32) -> (i32, i32) {
    %c0_i32 = arith.constant 0 : i32
    %c0_i32_0 = arith.constant 0 : i32
    %c0_i32_1 = arith.constant 0 : i32
    return %c0_i32, %c0_i32_0 : i32, i32
  }
  func.func @transform_6(%arg0: i32) -> (i32, i32) {
    %c0_i32 = arith.constant 0 : i32
    %c0_i32_0 = arith.constant 0 : i32
    %c0_i32_1 = arith.constant 0 : i32
    return %c0_i32, %c0_i32_0 : i32, i32
  }
  func.func @transform_7(%arg0: i32) -> (i32, i32) {
    %c0_i32 = arith.constant 0 : i32
    %c0_i32_0 = arith.constant 0 : i32
    %c0_i32_1 = arith.constant 0 : i32
    return %c0_i32, %c0_i32_0 : i32, i32
  }
  func.func @transform_8(%arg0: i32) -> (i32, i32) {
    %c0_i32 = arith.constant 0 : i32
    %c0_i32_0 = arith.constant 0 : i32
    %c0_i32_1 = arith.constant 0 : i32
    return %c0_i32, %c0_i32_0 : i32, i32
  }
  func.func @transform_9(%arg0: i32) -> (i32, i32) {
    %c0_i32 = arith.constant 0 : i32
    %c0_i32_0 = arith.constant 0 : i32
    %c0_i32_1 = arith.constant 0 : i32
    return %c0_i32, %c0_i32_0 : i32, i32
  }
  func.func @transform_10(%arg0: i32) -> (i32, i32) {
    %c0_i32 = arith.constant 0 : i32
    %c0_i32_0 = arith.constant 0 : i32
    %c0_i32_1 = arith.constant 0 : i32
    return %c0_i32, %c0_i32_0 : i32, i32
  }
  func.func @transform_11(%arg0: i32) -> (i32, i32, i32) {
    %c0_i32 = arith.constant 0 : i32
    %c0_i32_0 = arith.constant 0 : i32
    %c0_i32_1 = arith.constant 0 : i32
    return %arg0, %c0_i32, %c0_i32_0 : i32, i32, i32
  }
}

</mosaic_0001>

<bundles_post_ra>
// kernel: tpu_custom_call.1
= control target key start
LH: loop header
LB: loop body
LE: loop exit
PB: predicated region body
PF: predicated region fallthrough
CT: control target
= control target key end

     0   :  { %s3487_s0 = inlined_call_operand.vmem [shape: f32[2,16,64], index: 0, kind: input, shape index: {}]   ;;  %s3488_s1 = inlined_call_operand.hbm [shape: f32[3,64], index: 1, kind: input, shape index: {}]   ;;  %s3489_s2 = inlined_call_operand.hbm [shape: f32[3,64], index: 2, kind: input, shape index: {}]   ;;  %s3490_s3 = inlined_call_operand.vmem [shape: bf16[64,192], index: 3, kind: input, shape index: {}]   ;;  %s3491_s4 = inlined_call_operand.vmem [shape: f32[1,192], index: 4, kind: input, shape index: {}]   ;;  %s3492_s5 = inlined_call_operand.hbm [shape: bf16[64,64], index: 5, kind: input, shape index: {}]   ;;  %s3493_s6 = inlined_call_operand.hbm [shape: f32[1,64], index: 6, kind: input, shape index: {}]   ;;  %s3494_s7 = inlined_call_operand.hbm [shape: bf16[64,128], index: 7, kind: input, shape index: {}]   ;;  %s3495_s8 = inlined_call_operand.hbm [shape: f32[1,128], index: 8, kind: input, shape index: {}]   ;;  %s3496_s9 = inlined_call_operand.vmem [shape: bf16[128,64], index: 9, kind: input, shape index: {}]   ;;  %s3497_s10 = inlined_call_operand.vmem [shape: f32[1,64], index: 10, kind: input, shape index: {}]   ;;  %s3498_s11 = inlined_call_operand.hbm [shape: f32[2,16,64], index: 11, kind: output, shape index: {}]  }
   0x1   :  { %3507 = sst [smem:[#allocation24_spill]] %s3488_s1 }
   0x2   :  { %3508 = sst [smem:[#allocation25_spill]] %s3489_s2 }
   0x3   :  { %16 = vsyncpa [#allocation3], 0 }
   0x4   :  { %17 = vsyncpa [#allocation6], 0 }
   0x5   :  { %18 = vsyncpa [#allocation9], 0 }
   0x6   :  { %19 = vsyncpa [#allocation12], 0 }
   0x7   :  { %20 = vsyncpa [#allocation4], 0 }
   0x8   :  { %22 = vsyncpa [#allocation4 + $0x1], 0  ;;  %s2931_s17 = smov 0   ;;  %s2933_s18 = smov 0  }
   0x9   :  { %s2935_s19 = smov 0   ;;  %s2937_s20 = smov 0  }
   0xa LB: > { %3509 = sst [smem:[#allocation19_spill]] %s2756_s17  ;;  %s2952_s21 = sadd.s32 4294967295, %s2768_s20   ;;  %s2768_s20 = sphi %s2937_s20, %s3534_s20   ;;  %s2764_s19 = sphi %s2935_s19, %s3536_s19   ;;  %s2760_s18 = sphi %s2933_s18, %s3538_s18   ;;  %s2756_s17 = sphi %s2931_s17, %s3537_s17  }
   0xb   : > { %3510 = sst [smem:[#allocation20_spill]] %s2764_s19  ;;  %s1894_s22 = sadd.s32 4294967294, %s2768_s20  }
   0xc   : > { %s2956_s23 = sadd.s32 1, %s2768_s20   ;;  %s271_s24 = sadd.s32 1, %s2764_s19 }
   0xd   : > { %3511 = sst [smem:[#allocation21_spill]] %s2956_s23  ;;  %s268_s25 = ssub.s32 %s2768_s20, %s2956_s23 }
   0xe   : > { %p281_p0 = scmp.ne.s32.totalorder %s2764_s19, %s2760_s18  ;;  %p269_p1 = scmp.eq.s32.totalorder %s268_s25, 0 }
   0xf   : > { %p282_p2 = scmp.eq.s32.totalorder %s2952_s21, 1  ;;  %p287_p3 = scmp.ne.s32.totalorder %s2760_s18, %s2756_s17 }
  0x10   : > { %p288_p4 = scmp.eq.s32.totalorder %s1894_s22, 1  ;;  %p1895_p7 = scmp.ge.s32.totalorder %s2768_s20, 1 }
  0x11   : > { %s2967_s26 = scalar_select %p269_p1, %s2764_s19, %s271_s24  }
  0x12   : > { %p2969_p5 = por %p282_p2, %p281_p0  ;;  %p2973_p6 = por %p288_p4, %p287_p3 }
  0x13   : > { %3512 = sst [smem:[#allocation22_spill]] %s2967_s26  ;;  %p295_p8 = scmp.lt.s32.totalorder %s2768_s20, 3 }
  0x14   : > { %s3513_s27 = scalar_select %p2969_p5, 1, 0 }
  0x15   : > { %s3514_s28 = scalar_select %p2973_p6, 1, 0 }
  0x16   : > { %p3502_p9 = scmp.eq.s32.totalorder %s2952_s21, 0  ;;  %p2980_p10 = pnand %p1895_p7, %p295_p8 }
  0x17   : > { %3515 = sst [smem:[#allocation23_spill]] %s3514_s28  ;;  %s2850_s30 = smov [#allocation5]  }
  0x18   : > { %s3516_s29 = scalar_select %p2980_p10, 1, 0 }
  0x19   : > { %s319_s12 = sshll.u32 %s2850_s30, 4  ;;  %p2111_p11 = pneg %p2980_p10  ;;  %s320_s12 = int_to_ptr.vmem [resolvable:$true] %s319_s12 }
  0x1a   : > { %s2851_s13 = smov [#allocation8]   ;;  %s2852_s16 = smov [#allocation2]  }
  0x1b   : > { %s349_s14 = sshll.u32 %s2851_s13, 4  ;;  %p2988_p12 = pnand %p3502_p9, %p2111_p11  ;;  %s2992_s14 = int_to_ptr.vmem [resolvable:$true] %s349_s14 }
  0x1c   : > { %s308_s22 = sshll.u32 %s2852_s16, 4  ;;  %s3518_s2 = sld [smem:[#allocation25_spill]]  ;;  %s2994_s22 = int_to_ptr.vmem [resolvable:$true] %s308_s22 }
  0x1d   : > { %p3004_p0 = pneg %p2988_p12 }
  0x22   : > { %s2442_s30 = scalar_lea.hbm %s3518_s2, 64 }
  0x23   : > { %p2443_p13 = scmp.ne.s32.totalorder %s3518_s2, %s2442_s30  ;;  %p2449_p3 = scmp.lt.u32.totalorder %s2442_s30, %s3518_s2 }
  0x25   : > { %p2445_p1 = pnand %p3004_p0, %p2443_p13 }
  0x27   : > { %p2446_p2 = pneg %p2445_p1 }
  0x29   : > { %p2451_p4 = pnand %p2449_p3, %p2446_p2 }
  0x2b   : > { %2454 = shalt.err (!%p2451_p4)
}
  0x2c   : > { %s2455_s24 = scalar_lea.vmem %s320_s12, 64  ;;  %p2463_p9 = scmp.lt.s32.totalorder %s320_s12, %s320_s12 }
  0x2d   : > { %p2456_p7 = scmp.ne.s32.totalorder %s320_s12, %s2455_s24  ;;  %p2464_p6 = scmp.lt.s32.totalorder %s2455_s24, %s2455_s24 }
  0x2f   : > { %p2458_p8 = pnand %p2456_p7, %p3004_p0  ;;  %p2465_p5 = por %p2464_p6, %p2463_p9 }
  0x31   : > { %p2459_p11 = pneg %p2458_p8 }
  0x33   : > { %p2466_p10 = pnand %p2465_p5, %p2459_p11 }
  0x35   : > { %2469 = shalt.err (!%p2466_p10)
}
  0x36   : > { %2117 = dma.hbm_to_vmem [thread:$0]  (!%p2988_p12), %s3518_s2, 64, %s320_s12, [#allocation6]  }
  0x37   : > { %s2470_s30 = scalar_lea.hbm %s3493_s6, 16 }
  0x38   : > { %p2471_p13 = scmp.ne.s32.totalorder %s3493_s6, %s2470_s30  ;;  %p2477_p5 = scmp.lt.u32.totalorder %s2470_s30, %s3493_s6 }
  0x3a   : > { %p2473_p1 = pnand %p2471_p13, %p3004_p0 }
  0x3c   : > { %p2474_p6 = pneg %p2473_p1 }
  0x3e   : > { %p2479_p9 = pnand %p2477_p5, %p2474_p6 }
  0x40   : > { %2482 = shalt.err (!%p2479_p9)
}
  0x41   : > { %s2483_s12 = scalar_lea.vmem %s2992_s14, 16  ;;  %s2490_s28 = scalar_lea.vmem %s2992_s14, 32 }
  0x42   : > { %p2484_p10 = scmp.ne.s32.totalorder %s2992_s14, %s2483_s12  ;;  %p2491_p4 = scmp.lt.s32.totalorder %s2992_s14, %s2992_s14 }
  0x43   : > { %p2492_p7 = scmp.lt.s32.totalorder %s2490_s28, %s2483_s12 }
  0x44   : > { %p2486_p2 = pnand %p2484_p10, %p3004_p0 }
  0x45   : > { %p2493_p8 = por %p2492_p7, %p2491_p4 }
  0x46   : > { %p2487_p3 = pneg %p2486_p2 }
  0x48   : > { %p2494_p11 = pnand %p2493_p8, %p2487_p3 }
  0x4a   : > { %2497 = shalt.err (!%p2494_p11)
}
  0x4b   : > { %2123 = dma.hbm_to_vmem [thread:$0]  (!%p2988_p12), %s3493_s6, 16, %s2992_s14, [#allocation9]  }
  0x4c   : > { %s3520_s1 = sld [smem:[#allocation24_spill]] }
  0x52   : > { %s2498_s25 = scalar_lea.hbm %s3520_s1, 64 }
  0x53   : > { %p2499_p13 = scmp.ne.s32.totalorder %s3520_s1, %s2498_s25  ;;  %p2505_p5 = scmp.lt.u32.totalorder %s2498_s25, %s3520_s1 }
  0x55   : > { %p2501_p1 = pnand %p2499_p13, %p3004_p0 }
  0x57   : > { %p2502_p6 = pneg %p2501_p1 }
  0x59   : > { %p2507_p9 = pnand %p2505_p5, %p2502_p6 }
  0x5b   : > { %2510 = shalt.err (!%p2507_p9)
}
  0x5c   : > { %s2511_s14 = scalar_lea.vmem %s2994_s22, 64  ;;  %p2519_p4 = scmp.lt.s32.totalorder %s2994_s22, %s2994_s22 }
  0x5d   : > { %p2512_p10 = scmp.ne.s32.totalorder %s2994_s22, %s2511_s14  ;;  %p2520_p7 = scmp.lt.s32.totalorder %s2511_s14, %s2511_s14 }
  0x5f   : > { %p2514_p2 = pnand %p2512_p10, %p3004_p0  ;;  %p2521_p8 = por %p2520_p7, %p2519_p4 }
  0x61   : > { %p2515_p3 = pneg %p2514_p2 }
  0x63   : > { %p2522_p11 = pnand %p2521_p8, %p2515_p3 }
  0x65   : > { %2525 = shalt.err (!%p2522_p11)
}
  0x66   : > { %2114 = dma.hbm_to_vmem [thread:$0]  (!%p2988_p12), %s3520_s1, 64, %s2994_s22, [#allocation3]  }
  0x67   : > { %s2853_s19 = smov [#allocation7]   ;;  %s2526_s30 = scalar_lea.hbm %s3492_s5, 512 }
  0x68   : > { %s335_s26 = sshll.u32 %s2853_s19, 4  ;;  %p2527_p13 = scmp.ne.s32.totalorder %s3492_s5, %s2526_s30  ;;  %s336_s26 = int_to_ptr.vmem [resolvable:$true] %s335_s26 }
  0x69   : > { %p2533_p5 = scmp.lt.u32.totalorder %s2526_s30, %s3492_s5 }
  0x6a   : > { %p2529_p1 = pnand %p2527_p13, %p3004_p0 }
  0x6c   : > { %p2530_p6 = pneg %p2529_p1 }
  0x6e   : > { %p2535_p9 = pnand %p2533_p5, %p2530_p6 }
  0x70   : > { %2538 = shalt.err (!%p2535_p9)
}
  0x71   : > { %s2539_s22 = scalar_lea.vmem %s336_s26, 512  ;;  %p2547_p4 = scmp.lt.s32.totalorder %s336_s26, %s336_s26 }
  0x72   : > { %p2540_p10 = scmp.ne.s32.totalorder %s336_s26, %s2539_s22  ;;  %p2548_p7 = scmp.lt.s32.totalorder %s2539_s22, %s2539_s22 }
  0x74   : > { %p2542_p2 = pnand %p2540_p10, %p3004_p0  ;;  %p2549_p8 = por %p2548_p7, %p2547_p4 }
  0x76   : > { %p2543_p3 = pneg %p2542_p2 }
  0x78   : > { %p2550_p11 = pnand %p2549_p8, %p2543_p3 }
  0x7a   : > { %2553 = shalt.err (!%p2550_p11)
}
  0x7b   : > { %s2854_s28 = smov 64   ;;  %s2855_s17 = smov 4  }
  0x7c   : > { %2120 = dma.hbm_to_vmem [thread:$0]  (!%p2988_p12), %s3492_s5, 512, %s336_s26, [#allocation6], %s2854_s28, %s2854_s28, %s2855_s17  }
  0x7d   : > { %s2856_s25 = smov [#allocation10]   ;;  %s2857_s16 = smov [#allocation11]  }
  0x7e   : > { %s359_s30 = sshll.u32 %s2856_s25, 4  ;;  %s373_s24 = sshll.u32 %s2857_s16, 4  ;;  %s360_s30 = int_to_ptr.vmem [resolvable:$true] %s359_s30  ;;  %s3085_s24 = int_to_ptr.vmem [resolvable:$true] %s373_s24 }
  0x7f   : > { %s2554_s22 = scalar_lea.hbm %s3494_s7, 512 }
  0x80   : > { %p2555_p13 = scmp.ne.s32.totalorder %s3494_s7, %s2554_s22  ;;  %p2561_p5 = scmp.lt.u32.totalorder %s2554_s22, %s3494_s7 }
  0x82   : > { %p2557_p1 = pnand %p2555_p13, %p3004_p0 }
  0x84   : > { %p2558_p6 = pneg %p2557_p1 }
  0x86   : > { %p2563_p9 = pnand %p2561_p5, %p2558_p6 }
  0x88   : > { %2566 = shalt.err (!%p2563_p9)
}
  0x89   : > { %s2567_s23 = scalar_lea.vmem %s360_s30, 512  ;;  %p2575_p4 = scmp.lt.s32.totalorder %s360_s30, %s360_s30 }
  0x8a   : > { %p2568_p10 = scmp.ne.s32.totalorder %s360_s30, %s2567_s23  ;;  %p2576_p7 = scmp.lt.s32.totalorder %s2567_s23, %s2567_s23 }
  0x8c   : > { %p2570_p2 = pnand %p2568_p10, %p3004_p0  ;;  %p2577_p8 = por %p2576_p7, %p2575_p4 }
  0x8e   : > { %p2571_p3 = pneg %p2570_p2 }
  0x90   : > { %p2578_p11 = pnand %p2577_p8, %p2571_p3 }
  0x92   : > { %2581 = shalt.err (!%p2578_p11)
}
  0x93   : > { %2126 = dma.hbm_to_vmem [thread:$0]  (!%p2988_p12), %s3494_s7, 512, %s360_s30, [#allocation9], %s2854_s28, %s2854_s28, %s2855_s17  }
  0x94   : > { %s2582_s12 = scalar_lea.hbm %s3495_s8, 16 }
  0x95   : > { %p2583_p13 = scmp.ne.s32.totalorder %s3495_s8, %s2582_s12  ;;  %p2589_p5 = scmp.lt.u32.totalorder %s2582_s12, %s3495_s8 }
  0x97   : > { %p2585_p1 = pnand %p2583_p13, %p3004_p0 }
  0x99   : > { %p2586_p6 = pneg %p2585_p1 }
  0x9b   : > { %p2591_p9 = pnand %p2589_p5, %p2586_p6 }
  0x9d   : > { %2594 = shalt.err (!%p2591_p9)
}
  0x9e   : > { %s2595_s28 = scalar_lea.vmem %s3085_s24, 16  ;;  %s2602_s17 = scalar_lea.vmem %s3085_s24, 32 }
  0x9f   : > { %p2596_p10 = scmp.ne.s32.totalorder %s3085_s24, %s2595_s28  ;;  %p2603_p4 = scmp.lt.s32.totalorder %s3085_s24, %s3085_s24 }
  0xa0   : > { %p2604_p7 = scmp.lt.s32.totalorder %s2602_s17, %s2595_s28 }
  0xa1   : > { %p2598_p2 = pnand %p2596_p10, %p3004_p0 }
  0xa2   : > { %p2605_p8 = por %p2604_p7, %p2603_p4 }
  0xa3   : > { %p2599_p3 = pneg %p2598_p2 }
  0xa5   : > { %p2606_p11 = pnand %p2605_p8, %p2599_p3 }
  0xa7   : > { %2609 = shalt.err (!%p2606_p11)
}
  0xa8   : > { %2129 = dma.hbm_to_vmem [thread:$0]  (!%p2988_p12), %s3495_s8, 16, %s3085_s24, [#allocation12]  }
  0xa9   : > { %p3521_p13 = scmp.ne.s32.totalorder %s3516_s29, 0 }
  0xaa   : > { %p3522_p0 = scmp.eq.s32.totalorder (!%p3521_p13), %s2952_s21, 0 }
  0xab   : > { %400 = sbr.rel (%p3521_p13) target bundleno = 4855 (0x12f7), region = 64 }
  0xb2   : > { %2735 = dma.done.wait (%p3522_p0), [#allocation3], 64   ;;  %p3523_p1 = pmov %p3522_p0 }
  0xb3   : > { %p3524_p6 = pmov %p3522_p0 }
  0xb4   : > { %2737 = vsyncadd (%p3523_p1), [#allocation3], 4294967232 }
  0xb5   : > { %2739 = dma.done.wait (%p3524_p6), [#allocation6], 576   ;;  %p3525_p5 = pmov %p3522_p0 }
  0xb6   : > { %p3526_p9 = pmov %p3522_p0 }
  0xb7   : > { %2741 = vsyncadd (%p3525_p5), [#allocation6], 4294966720 }
  0xb8   : > { %2743 = dma.done.wait (%p3526_p9), [#allocation9], 528   ;;  %p3527_p12 = pmov %p3522_p0 }
  0xb9   : > { %p3528_p10 = pmov %p3522_p0 }
  0xba   : > { %2745 = vsyncadd (%p3527_p12), [#allocation9], 4294966768 }
  0xbb   : > { %2747 = dma.done.wait (%p3528_p10), [#allocation12], 16   ;;  %p3529_p2 = pmov %p3522_p0 }
  0xbc   : > { %p460_p3 = scmp.lt.s32.totalorder %s2952_s21, 1  ;;  %vm470_vm0 = vcmask 523264   ;;  %v2359_v14 = vld [vmem:[%s3490_s3 + $0x4] ss:$8 sps:$4 sm:$0xff]   ;;  %v2361_v15 = vld [vmem:[%s3490_s3] ss:$8 sps:$4 sm:$0xff]   ;;  %v498_v27 = vlaneseq }
  0xbd   : > { %2749 = vsyncadd (%p3529_p2), [#allocation12], 4294967280  ;;  %574 = vmatprep.subr.bf16.mxu1 %v2359_v14  ;;  %v2362_v16 = vld [vmem:[%s3490_s3 + $0x14] ss:$8 sps:$4 sm:$0xff]   ;;  %v2364_v17 = vld [vmem:[%s3490_s3 + $0x10] ss:$8 sps:$4 sm:$0xff]  }
  0xbe   : > { %s461_s29 = scalar_select %p460_p3, %s2952_s21, 1  ;;  %575 = vmatpush1.bf16.msra.mxu1 %v2361_v15  ;;  %v2365_v18 = vld [vmem:[%s3490_s3 + $0x24] ss:$8 sps:$4 sm:$0xff]   ;;  %v2367_v19 = vld [vmem:[%s3490_s3 + $0x20] ss:$8 sps:$4 sm:$0xff]   ;;  %v2858_v22 = vmov 0  }
  0xbf   : > { %576 = vmatprep.subr.bf16.mxu1 %v2362_v16  ;;  %v2368_v20 = vld [vmem:[%s3490_s3 + $0x34] ss:$8 sps:$4 sm:$0xff]   ;;  %v2370_v21 = vld [vmem:[%s3490_s3 + $0x30] ss:$8 sps:$4 sm:$0xff]   ;;  %606 = vmatprep.mubr.bf16.mxu1 %v2858_v22  ;;  %v3193_v30 = vshrl.u32 %v498_v27, 7  ;;  %v2859_v46 = vmov 0.0  }
  0xc0   : > { %s1956_s15 = sshll.u32 %s461_s29, 4  ;;  %s457_s29 = sand.u32 1, %s2760_s18   ;;  %v3196_v32 = vld [vmem:[#allocation2] sm:$0x7]  ;;  %v3199_v36 = vld [vmem:[#allocation5] sm:$0x7] }
  0xc1   : > { %s464_s1 = scalar_lea.vmem %s3487_s0, %s1956_s15  ;;  %s3188_s24 = sshll.u32 %s457_s29, 4  ;;  %v500_v31 = vsub.s32 0, %v3193_v30  ;;  %v519_v45 = vld [vmem:[%s3491_s4] sm:$0x3]  ;;  %v3208_v47 = vsub.s32 1, %v3193_v30  ;;  %vm2860_vm1 = vmmov 0  }
  0xc2   : > { %v3152_v0 = vld [vmem:[%s464_s1] sm:$0xff]  ;;  %v3154_v1 = vld [vmem:[%s464_s1 + $0x8] sm:$0xff]  ;;  %577 = vmatpush1.bf16.msra.mxu1 %v2364_v17  ;;  %s2861_s12 = smov 64   ;;  %vm622_vm2 = vcmask 130048   ;;  %s3224_s14 = scalar_lea.vmem [#allocation13], %s3188_s24  ;;  %v2778_v14 = vmov -1.0  }
  0xc3   : > { %v471_v2 = vsel %vm470_vm0, %v3152_v0, 0.0  ;;  %v474_v3 = vsel %vm470_vm0, %v3154_v1, 0.0  ;;  %578 = vmatprep.subr.bf16.mxu1 %v2365_v18  ;;  %v501_v35 = vrot.slane %v3196_v32, %v500_v31  ;;  %v507_v40 = vrot.slane %v3199_v36, %v500_v31  ;;  %s3226_s22 = smov 0  }
  0xc4   : > { %472 = vadd.xlane.f32.xlu0 %v471_v2  ;;  %v524_v48 = vrot.slane %v519_v45, %v500_v31  ;;  %v528_v50 = vrot.slane %v519_v45, %v3208_v47  ;;  %v2782_v15 = vmov -1.0  }
  0xc6   : > { %579 = vmatpush1.bf16.msra.mxu1 %v2367_v19 }
  0xc7   : > { %580 = vmatprep.subr.bf16.mxu1 %v2368_v20 }
  0xc8   : > { %475 = vadd.xlane.f32.xlu0 %v474_v3 }
  0xca   : > { %581 = vmatpush1.bf16.msra.mxu1 %v2370_v21 }
  0xcb   : > { %1993 = vmatprep.subr.bf16.mxu1 %v2859_v46 }
 0x151   : > { %v473_v4 = vpop.xlane.xlu0 %472 }
 0x152   : > { %v478_v5 = vmul.f32 0.015625, %v473_v4 }
 0x154   : > { %v480_v6 = vsub.f32 %v3152_v0, %v478_v5 }
 0x155   : > { %v476_v7 = vpop.xlane.xlu0 %475 }
 0x156   : > { %v479_v8 = vmul.f32 0.015625, %v476_v7  ;;  %v482_v9 = vmul.f32 %v480_v6, %v480_v6 }
 0x158   : > { %v481_v10 = vsub.f32 %v3154_v1, %v479_v8  ;;  %v484_v11 = vsel %vm470_vm0, %v482_v9, 0.0 }
 0x159   : > { %485 = vadd.xlane.f32.xlu1 %v484_v11 }
 0x15a   : > { %v483_v12 = vmul.f32 %v481_v10, %v481_v10 }
 0x15c   : > { %v487_v13 = vsel %vm470_vm0, %v483_v12, 0.0  ;;  %v2770_v12 = vmov 0.0  }
 0x15d   : > { %488 = vadd.xlane.f32.xlu1 %v487_v13  ;;  %v2774_v13 = vmov 0.0  }
 0x1e6   : > { %v486_v23 = vpop.xlane.xlu1 %485 }
 0x1e7   : > { %v490_v24 = vmul.f32 0.015625, %v486_v23 }
 0x1e9   : > { %v492_v25 = vadd.f32 1e-05, %v490_v24 }
 0x1ea   : > { %v489_v26 = vpop.xlane.xlu1 %488 }
 0x1eb   : > { %2371 = vrsqrt.f32 %v492_v25  ;;  %v491_v28 = vmul.f32 0.015625, %v489_v26 }
 0x1ed   : > { %v493_v29 = vadd.f32 1e-05, %v491_v28 }
 0x1ef   : > { %2373 = vrsqrt.f32 %v493_v29 }
 0x1f5   : > { %v2372_v33 = vpop.eup %2371 }
 0x1f6   : > { %v496_v34 = vmul.f32 %v2372_v33, %v480_v6 }
 0x1f8   : > { %v502_v39 = vmul.f32 %v501_v35, %v496_v34 }
 0x1f9   : > { %v2374_v37 = vpop.eup %2373 }
 0x1fa   : > { %v497_v38 = vmul.f32 %v2374_v37, %v481_v10  ;;  %v508_v42 = vadd.f32 %v507_v40, %v502_v39 }
 0x1fc   : > { %v503_v41 = vmul.f32 %v501_v35, %v497_v38 }
 0x1fe   : > { %v509_v43 = vadd.f32 %v507_v40, %v503_v41 }
 0x200   : > { %v510_v44 = vpack.c.bf16 %v509_v43, %v508_v42 }
 0x202   : > { %1921 = vmatmul.mubr.msk.bf16.vlgmr.msra.gmra.mrb[0].mxu1 %vm470_vm0, %v510_v44 }
 0x203   : > { %1995 = vmatprep.mubr.msk.bf16.mxu1 %vm2860_vm1, %v2859_v46 }
 0x2d5   : > { %v608_v49 = vpop.f32.mrb[0].mxu1 }
 0x2d6   : > { %v609_v51 = vadd.f32 %v608_v49, %v524_v48  ;;  %v610_v52 = vpop.f32.mrb[1].mxu1 }
 0x2d7   : > { %v612_v53 = vpop.f32.mrb[2].mxu1  ;;  %v611_v56 = vadd.f32 %v610_v52, %v528_v50 }
 0x2d8   : > { %v613_v54 = vadd.f32 %v612_v53, %v524_v48  ;;  %v614_v55 = vpop.f32.mrb[3].mxu1 }
 0x2d9   : > { %v615_v57 = vadd.f32 %v614_v55, %v528_v50 }
 0x2da   : > { %v3213_v58 = vpack.c.bf16 %v613_v54, %v609_v51 }
 0x2db   : > { %v3215_v59 = vpack.c.bf16 %v615_v57, %v611_v56 }
 0x2dc   : > { %620 = vrot.lane.b32.xlu0 %v3213_v58, %s2861_s12 }
 0x34e   : > { %v621_v60 = vpop.permute.xlu0 %620 }
 0x34f   : > { %v627_v61 = vsel %vm622_vm2, %v621_v60, 0 }
 0x350   : > { %1994 = vmatpush3.bf16.xpose.msra.mxu1 %v627_v61 }
 0x357   : > { %1996 = vmatmul.mubr.msk.bf16.vlgmr.msra.gmra.mrb[4].mxu1 %vm622_vm2, %v3213_v58 }
 0x42a   : > { %v663_v62 = vpop.f32.mrb[4].mxu1 }
 0x42b   : > { %v1997_v63 = vpop.f32.mrb[5].mxu1  ;;  %v670_v2 = vsel %vm622_vm2, %v663_v62, -inf }
 0x42c   : > { %671 = vmax.xlane.f32.xlu1 %v670_v2  ;;  %v666_v3 = vpop.f32.mrb[6].mxu1 }
 0x42d   : > { %v1998_v4 = vpop.f32.mrb[7].mxu1  ;;  %v673_v5 = vsel %vm622_vm2, %v666_v3, -inf }
 0x430   : > { %674 = vmax.xlane.f32.xlu1 %v673_v5 }
 0x4b9   : > { %v672_v6 = vpop.xlane.xlu1 %671 }
 0x4ba   : > { %v676_v7 = vsub.f32 %v663_v62, %v672_v6 }
 0x4bc   : > { %v678_v8 = vmul.f32 0.125, %v676_v7 }
 0x4bd   : > { %v675_v9 = vpop.xlane.xlu1 %674 }
 0x4be   : > { %v677_v10 = vsub.f32 %v666_v3, %v675_v9 }
 0x4c0   : > { %v679_v11 = vmul.f32 0.125, %v677_v10 }
 0x4c1 LB: >> { %v690_v16 = vadd.f32 %v2776_v13, %v2784_v15  ;;  %v691_v17 = vadd.f32 %v2772_v12, %v2780_v14  ;;  %s685_s22 = sadd.s32 1, %s2788_s22   ;;  %s2788_s22 = sphi %s3226_s22, %s685_s22   ;;  %v2784_v15 = vphi %v2782_v15, %v2783_v15   ;;  %v2780_v14 = vphi %v2778_v14, %v2779_v14   ;;  %v2776_v13 = vphi %v2774_v13, %v2775_v13   ;;  %v2772_v12 = vphi %v2770_v12, %v2771_v12  }
 0x4c2   : >> { %p682_p4 = scmp.ge.s32.totalorder %s685_s22, 30  }
 0x4c3   : >> { %v692_v18 = vmul.f32 0.5, %v690_v16  ;;  %v693_v19 = vmul.f32 0.5, %v691_v17  ;;  %2005 = vmatprep.subr.bf16.mxu0 (%p682_p4), %v2859_v46  ;;  %2007 = vmatprep.mubr.msk.bf16.mxu0 (%p682_p4), %vm2860_vm1, %v2859_v46  ;;  %s2862_s19 = smov (%p682_p4), 48   ;;  %s2863_s26 = smov (%p682_p4), 112   ;;  %v2790_v17 = vmov (%p682_p4), 0.0  }
 0x4c4   : > { %1999 = vmatprep.subr.bf16.mxu1 (%p682_p4), %v2859_v46  ;;  %2001 = vmatprep.mubr.msk.bf16.mxu1 (%p682_p4), %vm2860_vm1, %v2859_v46  ;;  %s3258_s28 = smov (%p682_p4), 0  }
 0x4c5   : >> { %v694_v20 = vsub.f32 %v678_v8, %v692_v18  ;;  %v695_v21 = vsub.f32 %v679_v11, %v693_v19  ;;  %2000 = vmatpush3.bf16.msra.mxu1 (%p682_p4), %v3215_v59 }
 0x4c7   : >> { %v696_v22 = vmax.f32 %v694_v20, 0.0  ;;  %v697_v23 = vmax.f32 %v695_v21, 0.0  ;;  %v2802_v20 = vmov (%p682_p4), -1.0  }
 0x4c9   : >> { %v698_v24 = vmul.f32 %v696_v22, %v696_v22  ;;  %v699_v25 = vmul.f32 %v697_v23, %v697_v23 }
 0x4cb   : >> { %v700_v26 = vsel %vm622_vm2, %v698_v24, 0.0  ;;  %v703_v27 = vsel %vm622_vm2, %v699_v25, 0.0 }
 0x4cc   : >> { %701 = vadd.xlane.f32.xlu0 %v700_v26 }
 0x4d0   : >> { %704 = vadd.xlane.f32.xlu0 %v703_v27 }
 0x4e6   : > { %779 = vrot.lane.b32.xlu0 (%p682_p4), %v3213_v58, %s2862_s19 }
 0x4ea   : > { %777 = vrot.lane.b32.xlu0 (%p682_p4), %v3213_v58, %s2863_s26 }
 0x559   : >> { %v702_v28 = vpop.xlane.xlu0 %701 }
 0x55a   : >> { %vm706_vm3 = vcmp.ge.f32.partialorder %v702_v28, 1.0  ;;  %684 = sbr.rel (!%p682_p4) target bundleno = 1217 (0x4c1), region = 152 }
 0x55b   : >> { %v708_v29 = vsel %vm706_vm3, %v692_v18, %v2784_v15   ;;  %v710_v31 = vsel %vm706_vm3, %v2776_v13, %v692_v18   ;;  %v2794_v18 = vmov (%p682_p4), 0.0  }
 0x55c   : >> { %v2775_v13 = vmov %v710_v31   ;;  %v2783_v15 = vmov %v708_v29   ;;  %v712_v37 = vadd.f32 (%p682_p4), %v710_v31, %v708_v29 }
 0x55d   : >> { %v705_v33 = vpop.xlane.xlu0 %704 }
 0x55e   : >> { %vm707_vm4 = vcmp.ge.f32.partialorder %v705_v33, 1.0  ;;  %v714_v39 = vmul.f32 (%p682_p4), 0.5, %v712_v37 }
 0x55f   : >> { %v709_v34 = vsel %vm707_vm4, %v693_v19, %v2780_v14   ;;  %v711_v35 = vsel %vm707_vm4, %v2772_v12, %v693_v19   ;;  %v2798_v19 = vmov (%p682_p4), -1.0  }
 0x560   : >> { %v2771_v12 = vmov %v711_v35   ;;  %v2779_v14 = vmov %v709_v34   ;;  %v713_v38 = vadd.f32 (%p682_p4), %v711_v35, %v709_v34  ;;  %v716_v41 = vsub.f32 (%p682_p4), %v678_v8, %v714_v39 }
 0x561   : > { %v780_v51 = vpop.permute.xlu0 %779 }
 0x562   : > { %v715_v40 = vmul.f32 0.5, %v713_v38  ;;  %v718_v43 = vmax.f32 %v716_v41, 0.0  ;;  %v785_v52 = vsel %vm622_vm2, %v780_v51, 0 }
 0x563   : > { %2006 = vmatpush3.bf16.xpose.msra.mxu0 %v785_v52 }
 0x564   : > { %v717_v42 = vsub.f32 %v679_v11, %v715_v40  ;;  %v720_v45 = vmul.f32 %v718_v43, %v718_v43 }
 0x565   : > { %v778_v53 = vpop.permute.xlu0 %777 }
 0x566   : > { %v719_v44 = vmax.f32 %v717_v42, 0.0  ;;  %v722_v49 = vsel %vm622_vm2, %v720_v45, 0.0 }
 0x567   : > { %723 = vadd.xlane.f32.xlu1 %v722_v49 }
 0x568   : > { %v721_v48 = vmul.f32 %v719_v44, %v719_v44 }
 0x56a   : > { %v725_v50 = vsel %vm622_vm2, %v721_v48, 0.0  ;;  %2008 = vmatmul.mubr.msk.bf16.vlgmr.msra.gmra.mrb[0].mxu0 %vm622_vm2, %v778_v53 }
 0x56b   : > { %726 = vadd.xlane.f32.xlu1 %v725_v50 }
 0x5f4   : > { %v724_v54 = vpop.xlane.xlu1 %723 }
 0x5f5   : > { %2375 = vrcp.f32 %v724_v54 }
 0x5f8   : > { %v727_v55 = vpop.xlane.xlu1 %726 }
 0x5f9   : > { %2377 = vrcp.f32 %v727_v55 }
 0x5ff   : > { %v2376_v56 = vpop.eup %2375 }
 0x600   : > { %v729_v57 = vmul.f32 %v2376_v56, %v720_v45 }
 0x603   : > { %v2378_v60 = vpop.eup %2377 }
 0x604   : > { %v731_v61 = vmul.f32 %v2378_v60, %v721_v48 }
 0x606   : > { %v732_v62 = vpack.c.bf16 %v731_v61, %v729_v57 }
 0x608   : > { %2002 = vmatmul.mubr.msk.bf16.vlgmr.msra.gmra.mrb[8].mxu1 %vm622_vm2, %v732_v62 }
 0x63d   : > { %v821_v63 = vpop.f32.mrb[0].mxu0 }
 0x63e   : > { %v2009_v2 = vpop.f32.mrb[1].mxu0  ;;  %v828_v3 = vsel %vm622_vm2, %v821_v63, -inf }
 0x63f   : > { %829 = vmax.xlane.f32.xlu0 %v828_v3  ;;  %v824_v4 = vpop.f32.mrb[2].mxu0 }
 0x640   : > { %v2010_v5 = vpop.f32.mrb[3].mxu0  ;;  %v831_v6 = vsel %vm622_vm2, %v824_v4, -inf }
 0x641   : > { %832 = vmax.xlane.f32.xlu1 %v831_v6 }
 0x6cc   : > { %v830_v11 = vpop.xlane.xlu0 %829 }
 0x6cd   : > { %v834_v12 = vsub.f32 %v821_v63, %v830_v11 }
 0x6ce   : > { %v833_v13 = vpop.xlane.xlu1 %832 }
 0x6cf   : > { %v836_v14 = vmul.f32 0.125, %v834_v12  ;;  %v835_v15 = vsub.f32 %v824_v4, %v833_v13 }
 0x6d1   : > { %v837_v16 = vmul.f32 0.125, %v835_v15 }
 0x6db   : > { %v3254_v7 = vpop.f32.mrb[8].mxu1 }
 0x6dc   : > { %v2003_v8 = vpop.f32.mrb[9].mxu1 }
 0x6dd   : > { %v3256_v9 = vpop.f32.mrb[10].mxu1 }
 0x6de   : > { %v2004_v10 = vpop.f32.mrb[11].mxu1 }
 0x6df LB: >> { %v848_v21 = vadd.f32 %v2796_v18, %v2804_v20  ;;  %v849_v22 = vadd.f32 %v2792_v17, %v2800_v19  ;;  %s843_s28 = sadd.s32 1, %s2808_s28   ;;  %s2808_s28 = sphi %s3258_s28, %s843_s28   ;;  %v2804_v20 = vphi %v2802_v20, %v2803_v20   ;;  %v2800_v19 = vphi %v2798_v19, %v2799_v19   ;;  %v2796_v18 = vphi %v2794_v18, %v2795_v18   ;;  %v2792_v17 = vphi %v2790_v17, %v2791_v17  }
 0x6e0   : >> { %p840_p7 = scmp.ge.s32.totalorder %s843_s28, 30  }
 0x6e1   : >> { %v850_v23 = vmul.f32 0.5, %v848_v21  ;;  %v851_v24 = vmul.f32 0.5, %v849_v22  ;;  %2017 = vmatprep.subr.bf16.mxu0 (%p840_p7), %v2859_v46  ;;  %2019 = vmatprep.mubr.msk.bf16.mxu0 (%p840_p7), %vm2860_vm1, %v2859_v46  ;;  %s2864_s17 = smov (%p840_p7), 32   ;;  %s2865_s30 = smov (%p840_p7), 96  }
 0x6e2   : > { %2011 = vmatprep.subr.bf16.mxu1 (%p840_p7), %v2859_v46  ;;  %2013 = vmatprep.mubr.msk.bf16.mxu1 (%p840_p7), %vm2860_vm1, %v2859_v46  ;;  %s3291_s23 = smov (%p840_p7), 0  }
 0x6e3   : >> { %v852_v25 = vsub.f32 %v836_v14, %v850_v23  ;;  %v853_v26 = vsub.f32 %v837_v16, %v851_v24 }
 0x6e5   : >> { %v854_v27 = vmax.f32 %v852_v25, 0.0  ;;  %v855_v28 = vmax.f32 %v853_v26, 0.0  ;;  %v2810_v25 = vmov (%p840_p7), 0.0   ;;  %v2814_v26 = vmov (%p840_p7), 0.0  }
 0x6e7   : >> { %v856_v29 = vmul.f32 %v854_v27, %v854_v27  ;;  %v857_v31 = vmul.f32 %v855_v28, %v855_v28  ;;  %v2818_v27 = vmov (%p840_p7), -1.0   ;;  %v2822_v28 = vmov (%p840_p7), -1.0  }
 0x6e9   : >> { %v858_v33 = vsel %vm622_vm2, %v856_v29, 0.0  ;;  %v861_v34 = vsel %vm622_vm2, %v857_v31, 0.0 }
 0x6ea   : >> { %859 = vadd.xlane.f32.xlu0 %v858_v33 }
 0x6ee   : >> { %862 = vadd.xlane.f32.xlu0 %v861_v34 }
 0x704   : > { %941 = vrot.lane.b32.xlu0 (%p840_p7), %v3213_v58, %s2864_s17 }
 0x708   : > { %939 = vrot.lane.b32.xlu0 (%p840_p7), %v3213_v58, %s2865_s30 }
 0x70c   : > { %892 = vrot.lane.b32.xlu0 (%p840_p7), %v3215_v59, %s2863_s26 }
 0x777   : >> { %v860_v35 = vpop.xlane.xlu0 %859 }
 0x778   : >> { %vm864_vm5 = vcmp.ge.f32.partialorder %v860_v35, 1.0  ;;  %842 = sbr.rel (!%p840_p7) target bundleno = 1759 (0x6df), region = 163 }
 0x779   : >> { %v866_v37 = vsel %vm864_vm5, %v850_v23, %v2804_v20   ;;  %v868_v38 = vsel %vm864_vm5, %v2796_v18, %v850_v23  }
 0x77a   : >> { %v2795_v18 = vmov %v868_v38   ;;  %v2803_v20 = vmov %v866_v37   ;;  %v870_v42 = vadd.f32 (%p840_p7), %v868_v38, %v866_v37 }
 0x77b   : >> { %v863_v39 = vpop.xlane.xlu0 %862 }
 0x77c   : >> { %vm865_vm6 = vcmp.ge.f32.partialorder %v863_v39, 1.0  ;;  %v872_v44 = vmul.f32 (%p840_p7), 0.5, %v870_v42 }
 0x77d   : >> { %v867_v40 = vsel %vm865_vm6, %v851_v24, %v2800_v19   ;;  %v869_v41 = vsel %vm865_vm6, %v2792_v17, %v851_v24  }
 0x77e   : >> { %v2791_v17 = vmov %v869_v41   ;;  %v2799_v19 = vmov %v867_v40   ;;  %v871_v43 = vadd.f32 (%p840_p7), %v869_v41, %v867_v40  ;;  %v874_v48 = vsub.f32 (%p840_p7), %v836_v14, %v872_v44 }
 0x77f   : > { %v942_v56 = vpop.permute.xlu0 %941 }
 0x780   : > { %v873_v45 = vmul.f32 0.5, %v871_v43  ;;  %v876_v50 = vmax.f32 %v874_v48, 0.0  ;;  %v947_v57 = vsel %vm622_vm2, %v942_v56, 0 }
 0x781   : > { %2018 = vmatpush3.bf16.xpose.msra.mxu0 %v947_v57 }
 0x782   : > { %v875_v49 = vsub.f32 %v837_v16, %v873_v45  ;;  %v878_v52 = vmul.f32 %v876_v50, %v876_v50 }
 0x783   : > { %v940_v60 = vpop.permute.xlu0 %939 }
 0x784   : > { %v877_v51 = vmax.f32 %v875_v49, 0.0  ;;  %v880_v54 = vsel %vm622_vm2, %v878_v52, 0.0 }
 0x785   : > { %881 = vadd.xlane.f32.xlu1 %v880_v54 }
 0x786   : > { %v879_v53 = vmul.f32 %v877_v51, %v877_v51 }
 0x787   : > { %v893_v61 = vpop.permute.xlu0 %892 }
 0x788   : > { %v883_v55 = vsel %vm622_vm2, %v879_v53, 0.0  ;;  %2020 = vmatmul.mubr.msk.bf16.vlgmr.msra.gmra.mrb[4].mxu0 %vm622_vm2, %v940_v60  ;;  %2012 = vmatpush3.bf16.msra.mxu1 %v893_v61 }
 0x789   : > { %884 = vadd.xlane.f32.xlu1 %v883_v55 }
 0x812   : > { %v882_v62 = vpop.xlane.xlu1 %881 }
 0x813   : > { %2379 = vrcp.f32 %v882_v62 }
 0x816   : > { %v885_v63 = vpop.xlane.xlu1 %884 }
 0x817   : > { %2381 = vrcp.f32 %v885_v63 }
 0x81d   : > { %v2380_v2 = vpop.eup %2379 }
 0x81e   : > { %v887_v3 = vmul.f32 %v2380_v2, %v878_v52 }
 0x821   : > { %v2382_v4 = vpop.eup %2381 }
 0x822   : > { %v889_v5 = vmul.f32 %v2382_v4, %v879_v53 }
 0x824   : > { %v890_v6 = vpack.c.bf16 %v889_v5, %v887_v3 }
 0x826   : > { %2014 = vmatmul.mubr.msk.bf16.vlgmr.msra.gmra.mrb[12].mxu1 %vm622_vm2, %v890_v6 }
 0x85b   : > { %v983_v8 = vpop.f32.mrb[4].mxu0 }
 0x85c   : > { %v2021_v10 = vpop.f32.mrb[5].mxu0  ;;  %v990_v11 = vsel %vm622_vm2, %v983_v8, -inf }
 0x85d   : > { %v986_v12 = vpop.f32.mrb[6].mxu0  ;;  %991 = vmax.xlane.f32.xlu1 %v990_v11 }
 0x85e   : > { %v2022_v13 = vpop.f32.mrb[7].mxu0  ;;  %v993_v14 = vsel %vm622_vm2, %v986_v12, -inf }
 0x85f   : > { %994 = vmax.xlane.f32.xlu0 %v993_v14 }
 0x8ea   : > { %v992_v19 = vpop.xlane.xlu1 %991 }
 0x8eb   : > { %v996_v20 = vsub.f32 %v983_v8, %v992_v19 }
 0x8ec   : > { %v995_v21 = vpop.xlane.xlu0 %994 }
 0x8ed   : > { %v998_v22 = vmul.f32 0.125, %v996_v20  ;;  %v997_v23 = vsub.f32 %v986_v12, %v995_v21 }
 0x8ef   : > { %v999_v24 = vmul.f32 0.125, %v997_v23 }
 0x8f9   : > { %v3287_v15 = vpop.f32.mrb[12].mxu1 }
 0x8fa   : > { %v2015_v16 = vpop.f32.mrb[13].mxu1 }
 0x8fb   : > { %v3289_v17 = vpop.f32.mrb[14].mxu1 }
 0x8fc   : > { %v2016_v18 = vpop.f32.mrb[15].mxu1 }
 0x8fd LB: >> { %v1010_v29 = vadd.f32 %v2816_v26, %v2824_v28  ;;  %v1011_v31 = vadd.f32 %v2812_v25, %v2820_v27  ;;  %s1005_s23 = sadd.s32 1, %s2828_s23   ;;  %s2828_s23 = sphi %s3291_s23, %s1005_s23   ;;  %v2824_v28 = vphi %v2822_v28, %v2823_v28   ;;  %v2820_v27 = vphi %v2818_v27, %v2819_v27   ;;  %v2816_v26 = vphi %v2814_v26, %v2815_v26   ;;  %v2812_v25 = vphi %v2810_v25, %v2811_v25  }
 0x8fe   : >> { %p1002_p8 = scmp.ge.s32.totalorder %s1005_s23, 30  }
 0x8ff   : >> { %v1012_v33 = vmul.f32 0.5, %v1010_v29  ;;  %v1013_v34 = vmul.f32 0.5, %v1011_v31  ;;  %2029 = vmatprep.subr.bf16.mxu0 (%p1002_p8), %v2859_v46  ;;  %2031 = vmatprep.mubr.msk.bf16.mxu0 (%p1002_p8), %vm2860_vm1, %v2859_v46  ;;  %s2866_s15 = smov (%p1002_p8), 16   ;;  %s2867_s13 = smov (%p1002_p8), 80  }
 0x900   : > { %2023 = vmatprep.subr.bf16.mxu1 (%p1002_p8), %v2859_v46  ;;  %2025 = vmatprep.mubr.msk.bf16.mxu1 (%p1002_p8), %vm2860_vm1, %v2859_v46  ;;  %s3324_s24 = smov (%p1002_p8), 0  }
 0x901   : >> { %v1014_v35 = vsub.f32 %v998_v22, %v1012_v33  ;;  %v1015_v37 = vsub.f32 %v999_v24, %v1013_v34 }
 0x903   : >> { %v1016_v38 = vmax.f32 %v1014_v35, 0.0  ;;  %v1017_v39 = vmax.f32 %v1015_v37, 0.0  ;;  %v2830_v37 = vmov (%p1002_p8), 0.0  }
 0x905   : >> { %v1018_v40 = vmul.f32 %v1016_v38, %v1016_v38  ;;  %v1019_v41 = vmul.f32 %v1017_v39, %v1017_v39  ;;  %v2834_v38 = vmov (%p1002_p8), 0.0   ;;  %v2838_v39 = vmov (%p1002_p8), -1.0  }
 0x907   : >> { %v1020_v42 = vsel %vm622_vm2, %v1018_v40, 0.0  ;;  %v1023_v43 = vsel %vm622_vm2, %v1019_v41, 0.0  ;;  %v2842_v40 = vmov (%p1002_p8), -1.0  }
 0x908   : >> { %1021 = vadd.xlane.f32.xlu0 %v1020_v42 }
 0x90c   : >> { %1024 = vadd.xlane.f32.xlu0 %v1023_v43 }
 0x922   : > { %1102 = vrot.lane.b32.xlu0 (%p1002_p8), %v3213_v58, %s2866_s15 }
 0x926   : > { %1100 = vrot.lane.b32.xlu0 (%p1002_p8), %v3213_v58, %s2867_s13 }
 0x92a   : > { %1053 = vrot.lane.b32.xlu0 (%p1002_p8), %v3215_v59, %s2865_s30 }
 0x995   : >> { %v1022_v44 = vpop.xlane.xlu0 %1021 }
 0x996   : >> { %vm1026_vm7 = vcmp.ge.f32.partialorder %v1022_v44, 1.0  ;;  %1004 = sbr.rel (!%p1002_p8) target bundleno = 2301 (0x8fd), region = 174 }
 0x997   : >> { %v1028_v45 = vsel %vm1026_vm7, %v1012_v33, %v2824_v28   ;;  %v1030_v48 = vsel %vm1026_vm7, %v2816_v26, %v1012_v33  }
 0x998   : >> { %v2815_v26 = vmov %v1030_v48   ;;  %v2823_v28 = vmov %v1028_v45   ;;  %v1032_v52 = vadd.f32 (%p1002_p8), %v1030_v48, %v1028_v45 }
 0x999   : >> { %v1025_v49 = vpop.xlane.xlu0 %1024 }
 0x99a   : >> { %vm1027_vm8 = vcmp.ge.f32.partialorder %v1025_v49, 1.0  ;;  %v1034_v54 = vmul.f32 (%p1002_p8), 0.5, %v1032_v52 }
 0x99b   : >> { %v1029_v50 = vsel %vm1027_vm8, %v1013_v34, %v2820_v27   ;;  %v1031_v51 = vsel %vm1027_vm8, %v2812_v25, %v1013_v34  }
 0x99c   : >> { %v2811_v25 = vmov %v1031_v51   ;;  %v2819_v27 = vmov %v1029_v50   ;;  %v1033_v53 = vadd.f32 (%p1002_p8), %v1031_v51, %v1029_v50  ;;  %v1036_v56 = vsub.f32 (%p1002_p8), %v998_v22, %v1034_v54 }
 0x99d   : > { %v1103_v4 = vpop.permute.xlu0 %1102 }
 0x99e   : > { %v1035_v55 = vmul.f32 0.5, %v1033_v53  ;;  %v1038_v60 = vmax.f32 %v1036_v56, 0.0  ;;  %v1108_v5 = vsel %vm622_vm2, %v1103_v4, 0 }
 0x99f   : > { %2030 = vmatpush3.bf16.xpose.msra.mxu0 %v1108_v5 }
 0x9a0   : > { %v1037_v57 = vsub.f32 %v999_v24, %v1035_v55  ;;  %v1040_v62 = vmul.f32 %v1038_v60, %v1038_v60 }
 0x9a1   : > { %v1101_v6 = vpop.permute.xlu0 %1100 }
 0x9a2   : > { %v1039_v61 = vmax.f32 %v1037_v57, 0.0  ;;  %v1042_v2 = vsel %vm622_vm2, %v1040_v62, 0.0 }
 0x9a3   : > { %1043 = vadd.xlane.f32.xlu1 %v1042_v2 }
 0x9a4   : > { %v1041_v63 = vmul.f32 %v1039_v61, %v1039_v61 }
 0x9a5   : > { %v1054_v8 = vpop.permute.xlu0 %1053 }
 0x9a6   : > { %v1045_v3 = vsel %vm622_vm2, %v1041_v63, 0.0  ;;  %2032 = vmatmul.mubr.msk.bf16.vlgmr.msra.gmra.mrb[8].mxu0 %vm622_vm2, %v1101_v6  ;;  %2024 = vmatpush3.bf16.msra.mxu1 %v1054_v8 }
 0x9a7   : > { %1046 = vadd.xlane.f32.xlu1 %v1045_v3 }
 0xa30   : > { %v1044_v58 = vpop.xlane.xlu1 %1043 }
 0xa31   : > { %2383 = vrcp.f32 %v1044_v58 }
 0xa34   : > { %v1047_v10 = vpop.xlane.xlu1 %1046 }
 0xa35   : > { %2385 = vrcp.f32 %v1047_v10 }
 0xa3b   : > { %v2384_v11 = vpop.eup %2383 }
 0xa3c   : > { %v1049_v12 = vmul.f32 %v2384_v11, %v1040_v62 }
 0xa3f   : > { %v2386_v13 = vpop.eup %2385 }
 0xa40   : > { %v1051_v14 = vmul.f32 %v2386_v13, %v1041_v63 }
 0xa42   : > { %v1052_v16 = vpack.c.bf16 %v1051_v14, %v1049_v12 }
 0xa44   : > { %2026 = vmatmul.mubr.msk.bf16.vlgmr.msra.gmra.mrb[16].mxu1 %vm622_vm2, %v1052_v16 }
 0xa79   : > { %v1144_v18 = vpop.f32.mrb[8].mxu0 }
 0xa7a   : > { %v2033_v19 = vpop.f32.mrb[9].mxu0  ;;  %v1151_v20 = vsel %vm622_vm2, %v1144_v18, -inf }
 0xa7b   : > { %v1147_v21 = vpop.f32.mrb[10].mxu0  ;;  %1152 = vmax.xlane.f32.xlu1 %v1151_v20 }
 0xa7c   : > { %v2034_v22 = vpop.f32.mrb[11].mxu0  ;;  %v1154_v23 = vsel %vm622_vm2, %v1147_v21, -inf }
 0xa7d   : > { %1155 = vmax.xlane.f32.xlu0 %v1154_v23 }
 0xb08   : > { %v1153_v28 = vpop.xlane.xlu1 %1152 }
 0xb09   : > { %v1157_v29 = vsub.f32 %v1144_v18, %v1153_v28 }
 0xb0a   : > { %v1156_v31 = vpop.xlane.xlu0 %1155 }
 0xb0b   : > { %v1159_v33 = vmul.f32 0.125, %v1157_v29  ;;  %v1158_v34 = vsub.f32 %v1147_v21, %v1156_v31 }
 0xb0d   : > { %v1160_v35 = vmul.f32 0.125, %v1158_v34 }
 0xb17   : > { %v3320_v24 = vpop.f32.mrb[16].mxu1 }
 0xb18   : > { %v2027_v25 = vpop.f32.mrb[17].mxu1 }
 0xb19   : > { %v3322_v26 = vpop.f32.mrb[18].mxu1 }
 0xb1a   : > { %v2028_v27 = vpop.f32.mrb[19].mxu1 }
 0xb1b LB: >> { %v1171_v41 = vadd.f32 %v2836_v38, %v2844_v40  ;;  %v1172_v42 = vadd.f32 %v2832_v37, %v2840_v39  ;;  %s1166_s24 = sadd.s32 1, %s2848_s24   ;;  %s2848_s24 = sphi %s3324_s24, %s1166_s24   ;;  %v2844_v40 = vphi %v2842_v40, %v2843_v40   ;;  %v2840_v39 = vphi %v2838_v39, %v2839_v39   ;;  %v2836_v38 = vphi %v2834_v38, %v2835_v38   ;;  %v2832_v37 = vphi %v2830_v37, %v2831_v37  }
 0xb1c   : >> { %p1163_p11 = scmp.ge.s32.totalorder %s1166_s24, 30  }
 0xb1d   : >> { %v1173_v43 = vmul.f32 0.5, %v1171_v41  ;;  %v1174_v44 = vmul.f32 0.5, %v1172_v42  ;;  %1214 = vrot.lane.b32.xlu1 (%p1163_p11), %v3215_v59, %s2867_s13  ;;  %2035 = vmatprep.subr.bf16.mxu1 (%p1163_p11), %v2859_v46  ;;  %v2387_v23 = vpack.i.bf16 (%p1163_p11), %v3289_v17, %v3287_v15  ;;  %v2392_v25 = vpack.i.bf16 (%p1163_p11), %v3322_v26, %v3320_v24  ;;  %v2402_v27 = vld [vmem:[#allocation7] sm:$0xff] (%p1163_p11)   ;;  %v2403_v28 = vld [vmem:[#allocation7 + $0x8] sm:$0xff] (%p1163_p11)   ;;  %v2404_v29 = vld [vmem:[#allocation7 + $0x10] sm:$0xff] (%p1163_p11)   ;;  %s1957_s16 = sshll.u32 (%p1163_p11), %s2952_s21, 8 }
 0xb1e   : > { %2037 = vmatprep.mubr.msk.bf16.mxu1 (%p1163_p11), %vm2860_vm1, %v2859_v46  ;;  %2041 = vmatprep.subr.bf16.mxu0 (%p1163_p11), %v2859_v46  ;;  %v2405_v15 = vld [vmem:[#allocation7 + $0x18] sm:$0xff] (%p1163_p11)   ;;  %vm1287_vm11 = vcmask (%p1163_p11), 261120   ;;  %vm1290_vm12 = vcmask (%p1163_p11), 392192   ;;  %s1704_s12 = sshll.u32 (%p1163_p11), %s3224_s14, 4  ;;  %s3438_s26 = scalar_lea.hbm (%p1163_p11), %s3498_s11, %s1957_s16  ;;  %s3440_s12 = int_to_ptr.vmem [resolvable:$true] %s1704_s12 }
 0xb1f   : >> { %v1175_v45 = vsub.f32 %v1159_v33, %v1173_v43  ;;  %v1176_v48 = vsub.f32 %v1160_v35, %v1174_v44  ;;  %2049 = vmatprep.mubr.msk.bf16.mxu0 (%p1163_p11), %vm2860_vm1, %v2859_v46  ;;  %2042 = vmatpush3.bf16.msra.mxu0 (%p1163_p11), %v2402_v27  ;;  %s3446_s28 = scalar_lea.sflag (%p1163_p11), [#allocation4], %s457_s29  ;;  %s2610_s21 = scalar_lea.vmem (%p1163_p11), %s3440_s12, 256 }
 0xb20   : > { %2043 = vmatprep.subr.bf16.mxu0 (%p1163_p11), %v2859_v46  ;;  %p2611_p13 = scmp.ne.s32.totalorder (%p1163_p11), %s3440_s12, %s2610_s21  ;;  %p3530_p0 = scmp.ne.s32.totalorder (%p1163_p11), %s3513_s27, 0 }
 0xb21   : >> { %v1177_v49 = vmax.f32 %v1175_v45, 0.0  ;;  %v1178_v50 = vmax.f32 %v1176_v48, 0.0  ;;  %2388 = vrot.lane.b32.xlu1 (%p1163_p11), %v2387_v23, %s2866_s15 }
 0xb22   : > { %p2612_p1 = pnand (%p1163_p11), %p2611_p13, %p3530_p0 }
 0xb23   : >> { %v1179_v51 = vmul.f32 %v1177_v49, %v1177_v49  ;;  %v1180_v52 = vmul.f32 %v1178_v50, %v1178_v50  ;;  %2044 = vmatpush3.bf16.msra.mxu0 (%p1163_p11), %v2403_v28 }
 0xb24   : > { %2045 = vmatprep.subr.bf16.mxu0 (%p1163_p11), %v2859_v46  ;;  %p2613_p6 = pneg (%p1163_p11), %p2612_p1 }
 0xb25   : >> { %v1181_v53 = vsel %vm622_vm2, %v1179_v51, 0.0  ;;  %v1184_v54 = vsel %vm622_vm2, %v1180_v52, 0.0 }
 0xb26   : >> { %1182 = vadd.xlane.f32.xlu0 %v1181_v53  ;;  %v1930_v53 = vld [vmem:[#allocation8] ss:$0 sm:$0xff] (%p1163_p11) }
 0xb27   : > { %2046 = vmatpush3.bf16.msra.mxu0 (%p1163_p11), %v2404_v29 }
 0xb28   : > { %2047 = vmatprep.subr.bf16.mxu0 (%p1163_p11), %v2859_v46 }
 0xb2a   : >> { %1185 = vadd.xlane.f32.xlu0 %v1184_v54 }
 0xb2b   : > { %2048 = vmatpush3.bf16.msra.mxu0 (%p1163_p11), %v2405_v15  ;;  %v1414_v15 = vrot.slane (%p1163_p11), %v3199_v36, %v3208_v47 }
 0xb2c   : > { %2065 = vmatprep.subr.bf16.mxu0 (%p1163_p11), %v2859_v46 }
 0xb8f   : > { %v1215_v13 = vpop.permute.xlu1 (%p1163_p11), %1214 }
 0xb90   : > { %2036 = vmatpush3.bf16.msra.mxu1 (%p1163_p11), %v1215_v13  ;;  %v2409_v13 = vld [vmem:[#allocation10 + $0x18] sm:$0xff] (%p1163_p11)  }
 0xb91   : > { %2053 = vmatprep.subr.bf16.mxu1 (%p1163_p11), %v2859_v46 }
 0xb93   : > { %v2389_v34 = vpop.permute.xlu1 (%p1163_p11), %2388 }
 0xbb3   : >> { %v1183_v55 = vpop.xlane.xlu0 %1182 }
 0xbb4   : >> { %vm1187_vm9 = vcmp.ge.f32.partialorder %v1183_v55, 1.0  ;;  %1165 = sbr.rel (!%p1163_p11) target bundleno = 2843 (0xb1b), region = 185 }
 0xbb5   : >> { %v1189_v56 = vsel %vm1187_vm9, %v1173_v43, %v2844_v40   ;;  %v1191_v57 = vsel %vm1187_vm9, %v2836_v38, %v1173_v43  }
 0xbb6   : >> { %v2835_v38 = vmov %v1191_v57   ;;  %v2843_v40 = vmov %v1189_v56   ;;  %v1193_v63 = vadd.f32 (%p1163_p11), %v1191_v57, %v1189_v56 }
 0xbb7   : >> { %v1186_v60 = vpop.xlane.xlu0 %1185 }
 0xbb8   : >> { %vm1188_vm10 = vcmp.ge.f32.partialorder %v1186_v60, 1.0  ;;  %v1195_v3 = vmul.f32 (%p1163_p11), 0.5, %v1193_v63 }
 0xbb9   : >> { %v1190_v61 = vsel %vm1188_vm10, %v1174_v44, %v2840_v39   ;;  %v1192_v62 = vsel %vm1188_vm10, %v2832_v37, %v1174_v44  }
 0xbba   : >> { %v2831_v37 = vmov %v1192_v62   ;;  %v2839_v39 = vmov %v1190_v61   ;;  %v1194_v2 = vadd.f32 (%p1163_p11), %v1192_v62, %v1190_v61  ;;  %v1197_v5 = vsub.f32 (%p1163_p11), %v1159_v33, %v1195_v3 }
 0xbbb   : > { %v2390_v37 = vunpack.i.l.bf16 %v2389_v34 }
 0xbbc   : > { %v1196_v4 = vmul.f32 0.5, %v1194_v2  ;;  %v1199_v8 = vmax.f32 %v1197_v5, 0.0 }
 0xbbd   : > { %v1285_v42 = vsel %vm622_vm2, %v3254_v7, %v2390_v37  ;;  %v2414_v37 = vld [vmem:[%s3496_s9 + $0x20] sm:$0xff]  }
 0xbbe   : > { %v1198_v6 = vsub.f32 %v1160_v35, %v1196_v4  ;;  %v1201_v10 = vmul.f32 %v1199_v8, %v1199_v8  ;;  %v2391_v35 = vunpack.i.h.bf16 %v2389_v34  ;;  %v2411_v34 = vld [vmem:[%s3496_s9 + $0x8] sm:$0xff]  }
 0xbc0   : > { %v1200_v58 = vmax.f32 %v1198_v6, 0.0  ;;  %v1203_v59 = vsel %vm622_vm2, %v1201_v10, 0.0  ;;  %v1286_v41 = vsel %vm622_vm2, %v3256_v9, %v2391_v35  ;;  %v2413_v35 = vld [vmem:[%s3496_s9 + $0x18] sm:$0xff]  }
 0xbc1   : > { %1204 = vadd.xlane.f32.xlu0 %v1203_v59  ;;  %v2407_v59 = vld [vmem:[#allocation10 + $0x8] sm:$0xff]  }
 0xbc2   : > { %v1202_v11 = vmul.f32 %v1200_v58, %v1200_v58 }
 0xbc4   : > { %v1206_v12 = vsel %vm622_vm2, %v1202_v11, 0.0 }
 0xbc5   : > { %1207 = vadd.xlane.f32.xlu0 %v1206_v12  ;;  %v2408_v12 = vld [vmem:[#allocation10 + $0x10] sm:$0xff]  }
 0xbdb   : > { %2393 = vrot.lane.b32.xlu0 %v2392_v25, %s2864_s17  ;;  %v1408_v25 = vrot.slane %v3196_v32, %v3208_v47  ;;  %v2412_v47 = vld [vmem:[%s3496_s9 + $0x10] sm:$0xff]   ;;  %s2868_s17 = smov [#allocation13]  }
 0xbdc   : > { %s2614_s30 = sshll.u32 %s2868_s17, 4  ;;  %s2615_s30 = int_to_ptr.vmem [resolvable:$false] %s2614_s30 }
 0xbdd   : > { %s2616_s23 = scalar_lea.vmem %s2615_s30, 512  ;;  %p2617_p5 = scmp.lt.s32.totalorder %s3440_s12, %s2615_s30 }
 0xbde   : > { %p2618_p9 = scmp.lt.s32.totalorder %s2616_s23, %s2610_s21 }
 0xbe0   : > { %p2619_p12 = por %p2618_p9, %p2617_p5 }
 0xbe2   : > { %p2620_p10 = pnand %p2619_p12, %p2613_p6 }
 0xc4e   : > { %v1205_v14 = vpop.xlane.xlu0 %1204 }
 0xc4f   : > { %2418 = vrcp.f32 %v1205_v14 }
 0xc52   : > { %v1208_v16 = vpop.xlane.xlu0 %1207 }
 0xc53   : > { %2420 = vrcp.f32 %v1208_v16 }
 0xc56   : > { %v2394_v38 = vpop.permute.xlu0 %2393 }
 0xc57   : > { %v2396_v39 = vunpack.i.h.bf16 %v2394_v38  ;;  %v2395_v40 = vunpack.i.l.bf16 %v2394_v38  ;;  %v2415_v38 = vld [vmem:[%s3496_s9 + $0x28] sm:$0xff]  }
 0xc59   : > { %v2419_v18 = vpop.eup %2418  ;;  %v1289_v48 = vsel %vm1287_vm11, %v1286_v41, %v2396_v39  ;;  %v1288_v49 = vsel %vm1287_vm11, %v1285_v42, %v2395_v40  ;;  %v2416_v39 = vld [vmem:[%s3496_s9 + $0x30] sm:$0xff]   ;;  %v2417_v40 = vld [vmem:[%s3496_s9 + $0x38] sm:$0xff]   ;;  %v1936_v41 = vld [vmem:[#allocation11] ss:$0 sm:$0xff] }
 0xc5a   : > { %v1210_v20 = vmul.f32 %v2419_v18, %v1201_v10 }
 0xc5d   : > { %v2421_v19 = vpop.eup %2420 }
 0xc5e   : > { %v1212_v21 = vmul.f32 %v2421_v19, %v1202_v11  ;;  %v2406_v11 = vld [vmem:[#allocation10] sm:$0xff]  }
 0xc60   : > { %v1213_v22 = vpack.c.bf16 %v1212_v21, %v1210_v20 }
 0xc62   : > { %2038 = vmatmul.mubr.msk.bf16.vlgmr.msra.gmra.mrb[20].mxu1 %vm622_vm2, %v1213_v22 }
 0xc63   : > { %2061 = vmatprep.mubr.msk.bf16.mxu1 %vm2860_vm1, %v2859_v46  ;;  %2054 = vmatpush3.bf16.msra.mxu1 %v2406_v11 }
 0xc64   : > { %2055 = vmatprep.subr.bf16.mxu1 %v2859_v46 }
 0xc67   : > { %2056 = vmatpush3.bf16.msra.mxu1 %v2407_v59 }
 0xc68   : > { %2057 = vmatprep.subr.bf16.mxu1 %v2859_v46 }
 0xc6b   : > { %2058 = vmatpush3.bf16.msra.mxu1 %v2408_v12 }
 0xc6c   : > { %2059 = vmatprep.subr.bf16.mxu1 %v2859_v46 }
 0xc6f   : > { %2060 = vmatpush3.bf16.msra.mxu1 %v2409_v13 }
 0xd35   : > { %v1254_v17 = vpop.f32.mrb[20].mxu1 }
 0xd36   : > { %v2039_v24 = vpop.f32.mrb[21].mxu1 }
 0xd37   : > { %v1257_v26 = vpop.f32.mrb[22].mxu1 }
 0xd38   : > { %v2397_v31 = vpack.i.bf16 %v1257_v26, %v1254_v17  ;;  %v2040_v33 = vpop.f32.mrb[23].mxu1 }
 0xd39   : > { %v2410_v33 = vld [vmem:[%s3496_s9] sm:$0xff]  }
 0xd3a   : > { %2398 = vrot.lane.b32.xlu1 %v2397_v31, %s2862_s19 }
 0xdac   : > { %v2399_v43 = vpop.permute.xlu1 %2398 }
 0xdad   : > { %v2401_v44 = vunpack.i.h.bf16 %v2399_v43  ;;  %v2400_v45 = vunpack.i.l.bf16 %v2399_v43 }
 0xdaf   : > { %v1291_v50 = vsel %vm1290_vm12, %v1288_v49, %v2400_v45  ;;  %v1292_v51 = vsel %vm1290_vm12, %v1289_v48, %v2401_v44 }
 0xdb0   : > { %v1293_v52 = vpack.c.bf16 %v1292_v51, %v1291_v50 }
 0xdb2   : > { %2050 = vmatmul.mubr.msk.bf16.vlgmr.msra.gmra.mrb[12].mxu0 %vm470_vm0, %v1293_v52 }
 0xdb3   : > { %2081 = vmatprep.mubr.msk.bf16.mxu0 %vm2860_vm1, %v2859_v46  ;;  %2066 = vmatpush3.bf16.msra.mxu0 %v2410_v33 }
 0xdb4   : > { %2067 = vmatprep.subr.bf16.mxu0 %v2859_v46 }
 0xdb7   : > { %2068 = vmatpush3.bf16.msra.mxu0 %v2411_v34 }
 0xdb8   : > { %2069 = vmatprep.subr.bf16.mxu0 %v2859_v46 }
 0xdbb   : > { %2070 = vmatpush3.bf16.msra.mxu0 %v2412_v47 }
 0xdbc   : > { %2071 = vmatprep.subr.bf16.mxu0 %v2859_v46 }
 0xdbf   : > { %2072 = vmatpush3.bf16.msra.mxu0 %v2413_v35 }
 0xdc0   : > { %2073 = vmatprep.subr.bf16.mxu0 %v2859_v46 }
 0xdc3   : > { %2074 = vmatpush3.bf16.msra.mxu0 %v2414_v37 }
 0xdc4   : > { %2075 = vmatprep.subr.bf16.mxu0 %v2859_v46 }
 0xdc7   : > { %2076 = vmatpush3.bf16.msra.mxu0 %v2415_v38 }
 0xdc8   : > { %2077 = vmatprep.subr.bf16.mxu0 %v2859_v46 }
 0xdcb   : > { %2078 = vmatpush3.bf16.msra.mxu0 %v2416_v39 }
 0xdcc   : > { %2079 = vmatprep.subr.bf16.mxu0 %v2859_v46 }
 0xdcf   : > { %2080 = vmatpush3.bf16.msra.mxu0 %v2417_v40 }
 0xe85   : > { %v1370_v9 = vpop.f32.mrb[12].mxu0 }
 0xe86   : > { %v1371_v54 = vadd.f32 %v1930_v53, %v1370_v9  ;;  %v2051_v55 = vpop.f32.mrb[13].mxu0 }
 0xe87   : > { %v1373_v7 = vpop.f32.mrb[14].mxu0 }
 0xe88   : > { %v3367_v56 = vadd.f32 %v1371_v54, %v3152_v0  ;;  %v1374_v57 = vadd.f32 %v1930_v53, %v1373_v7  ;;  %v2052_v60 = vpop.f32.mrb[15].mxu0 }
 0xe8a   : > { %v3370_v61 = vadd.f32 %v1374_v57, %v3154_v1  ;;  %v1379_v62 = vsel %vm470_vm0, %v3367_v56, 0.0 }
 0xe8b   : > { %1380 = vadd.xlane.f32.xlu1 %v1379_v62 }
 0xe8c   : > { %v1382_v63 = vsel %vm470_vm0, %v3370_v61, 0.0 }
 0xe8d   : > { %1383 = vadd.xlane.f32.xlu0 %v1382_v63 }
 0xf18   : > { %v1381_v2 = vpop.xlane.xlu1 %1380 }
 0xf19   : > { %v1385_v3 = vmul.f32 0.015625, %v1381_v2 }
 0xf1a   : > { %v1384_v4 = vpop.xlane.xlu0 %1383 }
 0xf1b   : > { %v1387_v5 = vsub.f32 %v3367_v56, %v1385_v3  ;;  %v1386_v0 = vmul.f32 0.015625, %v1384_v4 }
 0xf1d   : > { %v1388_v6 = vsub.f32 %v3370_v61, %v1386_v0  ;;  %v1389_v8 = vmul.f32 %v1387_v5, %v1387_v5 }
 0xf1f   : > { %v1391_v1 = vsel %vm470_vm0, %v1389_v8, 0.0  ;;  %v1390_v58 = vmul.f32 %v1388_v6, %v1388_v6 }
 0xf20   : > { %1392 = vadd.xlane.f32.xlu1 %v1391_v1 }
 0xf21   : > { %v1394_v10 = vsel %vm470_vm0, %v1390_v58, 0.0 }
 0xf24   : > { %1395 = vadd.xlane.f32.xlu1 %v1394_v10 }
 0xfad   : > { %v1393_v14 = vpop.xlane.xlu1 %1392 }
 0xfae   : > { %v1397_v16 = vmul.f32 0.015625, %v1393_v14 }
 0xfb0   : > { %v1399_v18 = vadd.f32 1e-05, %v1397_v16 }
 0xfb1   : > { %v1396_v19 = vpop.xlane.xlu1 %1395 }
 0xfb2   : > { %2422 = vrsqrt.f32 %v1399_v18  ;;  %v1398_v20 = vmul.f32 0.015625, %v1396_v19 }
 0xfb4   : > { %v1400_v21 = vadd.f32 1e-05, %v1398_v20 }
 0xfb6   : > { %2424 = vrsqrt.f32 %v1400_v21 }
 0xfbc   : > { %v2423_v22 = vpop.eup %2422 }
 0xfbd   : > { %v1403_v23 = vmul.f32 %v2423_v22, %v1387_v5  ;;  %v1942_v22 = vld [vmem:[%s3497_s10] ss:$0 sm:$0xff] }
 0xfbf   : > { %v1409_v29 = vmul.f32 %v1408_v25, %v1403_v23 }
 0xfc0   : > { %v2425_v27 = vpop.eup %2424 }
 0xfc1   : > { %v1404_v28 = vmul.f32 %v2425_v27, %v1388_v6  ;;  %v1415_v24 = vadd.f32 %v1414_v15, %v1409_v29 }
 0xfc3   : > { %v1410_v17 = vmul.f32 %v1408_v25, %v1404_v28 }
 0xfc5   : > { %v1416_v26 = vadd.f32 %v1414_v15, %v1410_v17 }
 0xfc7   : > { %v1417_v31 = vpack.c.bf16 %v1416_v26, %v1415_v24 }
 0xfc9   : > { %2062 = vmatmul.mubr.msk.bf16.vlgmr.msra.gmra.mrb[24].mxu1 %vm470_vm0, %v1417_v31 }
0x109c   : > { %v1494_v42 = vpop.f32.mrb[24].mxu1 }
0x109d   : > { %v1495_v43 = vadd.f32 %v1936_v41, %v1494_v42  ;;  %v2063_v44 = vpop.f32.mrb[25].mxu1 }
0x109e   : > { %v1497_v45 = vpop.f32.mrb[26].mxu1 }
0x109f   : > { %v1503_v48 = vand.u32 2147483647, %v1495_v43  ;;  %v1498_v49 = vadd.f32 %v1936_v41, %v1497_v45  ;;  %v2064_v50 = vpop.f32.mrb[27].mxu1  ;;  %v1501_v1 = vmax.f32 %v1495_v43, 0.0 }
0x10a1   : > { %v1505_v51 = vsub.f32 0.0, %v1503_v48  ;;  %v1504_v52 = vand.u32 2147483647, %v1498_v49  ;;  %v1502_v12 = vmax.f32 %v1498_v49, 0.0 }
0x10a3   : > { %v1507_v53 = vmul.f32 1.442695, %v1505_v51  ;;  %v1506_v9 = vsub.f32 0.0, %v1504_v52 }
0x10a5   : > { %2426 = vpow2.f32 %v1507_v53  ;;  %v1509_v54 = vmul.f32 1.442695, %v1506_v9 }
0x10a7   : > { %2428 = vpow2.f32 %v1509_v54 }
0x10af   : > { %v2427_v46 = vpop.eup %2426 }
0x10b0   : > { %v1511_v55 = vadd.f32 1.0, %v2427_v46  ;;  %v1514_v60 = vmul.f32 -0.5, %v2427_v46  ;;  %v1517_v2 = vand.u32 2147483647, %v2427_v46 }
0x10b1   : > { %v2429_v7 = vpop.eup %2428 }
0x10b2   : > { %2430 = vlog2.f32 %v1511_v55  ;;  %v1520_v57 = vadd.f32 1.0, %v2429_v7  ;;  %v1523_v62 = vmul.f32 -0.5, %v2429_v7  ;;  %v1515_v63 = vadd.f32 1.0, %v1514_v60 }
0x10b3   : > { %v1526_v5 = vand.u32 2147483647, %v2429_v7  ;;  %vm1518_vm13 = vcmp.lt.f32.partialorder %v1517_v2, 0.0004427343 }
0x10b4   : > { %2432 = vlog2.f32 %v1520_v57  ;;  %v1524_v3 = vadd.f32 1.0, %v1523_v62  ;;  %v1516_v6 = vmul.f32 %v2427_v46, %v1515_v63 }
0x10b5   : > { %vm1527_vm14 = vcmp.lt.f32.partialorder %v1526_v5, 0.0004427343 }
0x10b6   : > { %v1525_v11 = vmul.f32 %v2429_v7, %v1524_v3 }
0x10bc   : > { %v2431_v4 = vpop.eup %2430 }
0x10bd   : > { %v1513_v0 = vmul.f32 0.6931472, %v2431_v4 }
0x10be   : > { %v2433_v8 = vpop.eup %2432 }
0x10bf   : > { %v1519_v58 = vsel %vm1518_vm13, %v1516_v6, %v1513_v0  ;;  %v1522_v10 = vmul.f32 0.6931472, %v2433_v8 }
0x10c0   : > { %v1529_v59 = vadd.f32 %v1519_v58, %v1501_v1 }
0x10c1   : > { %v1528_v13 = vsel %vm1527_vm14, %v1525_v11, %v1522_v10 }
0x10c2   : > { %2434 = vtanh.f32 %v1529_v59  ;;  %v1530_v14 = vadd.f32 %v1528_v13, %v1502_v12 }
0x10c4   : > { %2436 = vtanh.f32 %v1530_v14 }
0x10cc   : > { %v2435_v16 = vpop.eup %2434 }
0x10cd   : > { %v1533_v19 = vmul.f32 %v2435_v16, %v1495_v43 }
0x10ce   : > { %v2437_v18 = vpop.eup %2436 }
0x10cf   : > { %v1534_v20 = vmul.f32 %v2437_v18, %v1498_v49  ;;  %v1678_v49 = vsub.s32 2, %v3193_v30 }
0x10d1   : > { %v1535_v21 = vpack.c.bf16 %v1534_v20, %v1533_v19  ;;  %v1679_v50 = vrot.slane %v3196_v32, %v1678_v49  ;;  %v1685_v53 = vrot.slane %v3199_v36, %v1678_v49 }
0x10d3   : > { %2082 = vmatmul.mubr.bf16.vlgmr.msra.gmra.mrb[16].mxu0 %v1535_v21 }
0x11a6   : > { %v1641_v23 = vpop.f32.mrb[16].mxu0 }
0x11a7   : > { %v1642_v25 = vadd.f32 %v1942_v22, %v1641_v23  ;;  %v2083_v27 = vpop.f32.mrb[17].mxu0 }
0x11a8   : > { %v1644_v28 = vpop.f32.mrb[18].mxu0 }
0x11a9   : > { %v1645_v29 = vadd.f32 %v1942_v22, %v1644_v28  ;;  %v2084_v15 = vpop.f32.mrb[19].mxu0  ;;  %v1648_v17 = vadd.f32 %v1642_v25, %v3367_v56 }
0x11ab   : > { %v1650_v24 = vsel %vm470_vm0, %v1648_v17, 0.0  ;;  %v1649_v26 = vadd.f32 %v1645_v29, %v3370_v61 }
0x11ac   : > { %1651 = vadd.xlane.f32.xlu1 %v1650_v24 }
0x11ad   : > { %v1653_v31 = vsel %vm470_vm0, %v1649_v26, 0.0 }
0x11b0   : > { %1654 = vadd.xlane.f32.xlu1 %v1653_v31 }
0x1239   : > { %v1652_v33 = vpop.xlane.xlu1 %1651 }
0x123a   : > { %v1656_v34 = vmul.f32 0.015625, %v1652_v33 }
0x123c   : > { %v1658_v47 = vsub.f32 %v1648_v17, %v1656_v34 }
0x123d   : > { %v1655_v35 = vpop.xlane.xlu1 %1654 }
0x123e   : > { %v1657_v37 = vmul.f32 0.015625, %v1655_v35  ;;  %v1660_v38 = vmul.f32 %v1658_v47, %v1658_v47 }
0x1240   : > { %v1659_v39 = vsub.f32 %v1649_v26, %v1657_v37  ;;  %v1662_v40 = vsel %vm470_vm0, %v1660_v38, 0.0 }
0x1241   : > { %1663 = vadd.xlane.f32.xlu0 %v1662_v40 }
0x1242   : > { %v1661_v41 = vmul.f32 %v1659_v39, %v1659_v39 }
0x1244   : > { %v1665_v56 = vsel %vm470_vm0, %v1661_v41, 0.0 }
0x1245   : > { %1666 = vadd.xlane.f32.xlu1 %v1665_v56 }
0x12ce   : > { %v1664_v42 = vpop.xlane.xlu0 %1663 }
0x12cf   : > { %v1668_v61 = vmul.f32 0.015625, %v1664_v42 }
0x12d1   : > { %v1670_v43 = vadd.f32 1e-05, %v1668_v61 }
0x12d2   : > { %v1667_v44 = vpop.xlane.xlu1 %1666 }
0x12d3   : > { %2438 = vrsqrt.f32 %v1670_v43  ;;  %v1669_v45 = vmul.f32 0.015625, %v1667_v44 }
0x12d5   : > { %v1671_v48 = vadd.f32 1e-05, %v1669_v45 }
0x12d7   : > { %2440 = vrsqrt.f32 %v1671_v48 }
0x12dd   : > { %v2439_v51 = vpop.eup %2438 }
0x12de   : > { %v1674_v52 = vmul.f32 %v2439_v51, %v1658_v47 }
0x12e0   : > { %v1680_v9 = vmul.f32 %v1679_v50, %v1674_v52 }
0x12e1   : > { %v2441_v54 = vpop.eup %2440 }
0x12e2   : > { %v1675_v46 = vmul.f32 %v2441_v54, %v1659_v39  ;;  %v1686_v55 = vadd.f32 %v1685_v53, %v1680_v9 }
0x12e4   : > { %v1681_v7 = vmul.f32 %v1679_v50, %v1675_v46  ;;  %1688 = vst.msk [vmem:[%s3224_s14] sm:$0xff] %vm470_vm0, %v1686_v55 }
0x12e6   : > { %v1687_v30 = vadd.f32 %v1685_v53, %v1681_v7 }
0x12e8   : > { %1689 = vst.msk [vmem:[%s3224_s14 + $0x8] sm:$0xff] %vm470_vm0, %v1687_v30 }
0x12e9   : > { %2623 = shalt.err (!%p2620_p10)
}
0x12ea   : > { %s2624_s29 = scalar_lea.hbm %s3438_s26, 256  ;;  %s2628_s13 = scalar_lea.hbm %s3498_s11, 512 }
0x12eb   : > { %p2625_p2 = scmp.ne.s32.totalorder %s3438_s26, %s2624_s29  ;;  %p2629_p7 = scmp.lt.u32.totalorder %s3438_s26, %s3498_s11 }
0x12ec   : > { %p2630_p8 = scmp.lt.u32.totalorder %s2628_s13, %s2624_s29  ;;  %p2632_p13 = scmp.lt.u32.totalorder %s2624_s29, %s3438_s26 }
0x12ed   : > { %p2626_p3 = pnand %p2625_p2, %p3530_p0 }
0x12ee   : > { %p2631_p11 = por %p2630_p8, %p2629_p7 }
0x12ef   : > { %p2627_p4 = pneg %p2626_p3 }
0x12f0   : > { %p2633_p1 = por %p2632_p13, %p2631_p11 }
0x12f2   : > { %p2634_p6 = pnand %p2633_p1, %p2627_p4 }
0x12f4   : > { %2637 = shalt.err (!%p2634_p6)
}
0x12f5   : > { %s2869_s2 = smov 128   ;;  %s2870_s25 = smov 8  }
0x12f6   : > { %2109 = dma.vmem_to_hbm [thread:$0]  (%p3530_p0), %s3440_s12, 256, %s3438_s26, %s3446_s28, %s2869_s2, %s2869_s2, %s2870_s25  }
0x12f7 PF: > { %s3531_s16 = sld [smem:[#allocation19_spill]]  ;;  %s3532_s22 = sld [smem:[#allocation23_spill]] }
0x12f8   : > { %p2146_p5 = scmp.ge.s32.totalorder %s2768_s20, 2 }
0x12fd   : > { %s1719_s19 = sand.u32 1, %s3531_s16   ;;  %p3533_p9 = scmp.ne.s32.totalorder %s3532_s22, 0 }
0x12fe   : > { %s1720_s21 = scalar_lea.sflag [#allocation4], %s1719_s19 }
0x12ff   : > { %p2131_p12 = pnand %p2146_p5, %p3533_p9 }
0x1301   : > { %2751 = dma.done.wait (!%p2131_p12), %s1720_s21, 256  }
0x1302   : > { %2753 = vsyncadd (!%p2131_p12), %s1720_s21, 4294967040  ;;  %s3534_s20 = sld [smem:[#allocation21_spill]]  ;;  %s3535_s30 = sld [smem:[#allocation20_spill]] }
0x1303   : > { %s3536_s19 = sld [smem:[#allocation22_spill]]  ;;  %s3537_s17 = smov %s2760_s18 }
0x1308   : > { %p25_p10 = scmp.ge.s32.totalorder %s3534_s20, 4   ;;  %s3538_s18 = smov %s3535_s30 }
0x130a   :  { %27 = sbr.rel (!%p25_p10) target bundleno = 10 (0xa), region = 196 }
0x1311   :  { %1725 = vsyncpa [#allocation3], 1 }
0x1312   :  { %1727 = vsyncpa [#allocation3 + $0x1], 1 }
0x1313   :  { %1728 = vsyncpa [#allocation6], 1 }
0x1314   :  { %1729 = vsyncpa [#allocation9], 1 }
0x1315   :  { %1730 = vsyncpa [#allocation12], 1 }
0x1316   :  { %1731 = vsyncpa [#allocation4], 1 }
0x1317   :  { %1733 = vsyncpa [#allocation4 + $0x1], 1 }

</bundles_post_ra>
